<compile_context>
chip_gen: v6e
topology: v6e:2x2x1
jax: 0.10.0
libtpu: 0.0.40
codegen_flags: <defaults>
</compile_context>

<pallas_src>
import functools

import jax
import jax.numpy as jnp
from jax.experimental import pallas as pl
from jax.experimental.pallas import tpu as pltpu

EPS = 1e-5
NEG_SLOPE = 0.1


def _round_up(x, m):
    return (x + m - 1) // m * m


# ----------------- phase 1a (recompute path): matmul + streaming stats -----------------

def conv_stats_kernel(a_ref, w_ref, sum_ref, sq_ref):
    # sum/sq blocks are keyed on the parallel axis only -> resident f32 accumulators
    # (one (8, c_pad) block per TensorCore slice; all 8 sublanes hold the same row).
    @pl.when(pl.program_id(1) == 0)
    def _():
        sum_ref[...] = jnp.zeros_like(sum_ref)
        sq_ref[...] = jnp.zeros_like(sq_ref)

    y = jnp.dot(a_ref[...], w_ref[...], preferred_element_type=jnp.float32)
    sum_ref[...] = sum_ref[...] + jnp.sum(y, axis=0, keepdims=True)
    sq_ref[...] = sq_ref[...] + jnp.sum(y * y, axis=0, keepdims=True)


# --------------- phase 1b (store path): matmul + stats + bf16 Y writeback ---------------

def conv_stats_store_kernel(a_ref, w_ref, y_ref, sum_ref, sq_ref):
    @pl.when(pl.program_id(1) == 0)
    def _():
        sum_ref[...] = jnp.zeros_like(sum_ref)
        sq_ref[...] = jnp.zeros_like(sq_ref)

    y = jnp.dot(a_ref[...], w_ref[...], preferred_element_type=jnp.float32)
    sum_ref[...] = sum_ref[...] + jnp.sum(y, axis=0, keepdims=True)
    sq_ref[...] = sq_ref[...] + jnp.sum(y * y, axis=0, keepdims=True)
    y_ref[...] = y.astype(y_ref.dtype)


# ------------- phase 2a (recompute path): matmul + affine BN + LeakyReLU ----------------

def conv_bn_lrelu_kernel(a_ref, w_ref, scale_ref, shift_ref, o_ref):
    y = jnp.dot(a_ref[...], w_ref[...], preferred_element_type=jnp.float32)
    z = y * scale_ref[...] + shift_ref[...]
    o_ref[...] = jnp.maximum(z, NEG_SLOPE * z).astype(o_ref.dtype)


# ------------- phase 2b (store path): elementwise BN + LeakyReLU over bf16 Y ------------

def bn_lrelu_kernel(y_ref, scale_ref, shift_ref, o_ref):
    z = y_ref[...].astype(jnp.float32) * scale_ref[...] + shift_ref[...]
    o_ref[...] = jnp.maximum(z, NEG_SLOPE * z).astype(o_ref.dtype)


# ------------------------------------ host-side glue ------------------------------------

def im2col_nchw(x_nchw, kh, kw, stride, pad):
    """[N, C, H, W] -> ([N*Ho*Wo, C*kh*kw], Ho, Wo); feature order (C, kh, kw)."""
    n, c, h, w = x_nchw.shape
    h_out = (h + 2 * pad - kh) // stride + 1
    w_out = (w + 2 * pad - kw) // stride + 1
    x_nhwc = jnp.transpose(x_nchw, (0, 2, 3, 1))                      # [N, H, W, C]
    x_pad = jnp.pad(x_nhwc, ((0, 0), (pad, pad), (pad, pad), (0, 0)))
    slabs = []
    for dh in range(kh):
        for dw in range(kw):
            slabs.append(x_pad[:, dh:dh + stride * h_out:stride,
                                  dw:dw + stride * w_out:stride, :])  # [N, Ho, Wo, C]
    stacked = jnp.stack(slabs, axis=0)                 # [kh*kw, N, Ho, Wo, C]
    stacked = jnp.transpose(stacked, (1, 2, 3, 4, 0))  # [N, Ho, Wo, C, kh*kw]
    return stacked.reshape(n * h_out * w_out, c * kh * kw), h_out, w_out


def _device_vmem_limit():
    """Pick a scoped-VMEM limit from the device: ~3/4 of physical, capped at 100 MiB."""
    cap = 64 * 1024 * 1024  # conservative fallback (v7x physical size)
    try:
        cap = int(getattr(pltpu.get_tpu_info(), "vmem_capacity_bytes", cap))
    except Exception:
        pass
    return max(32 * 1024 * 1024, min(cap * 3 // 4, 100 * 1024 * 1024))


def _pick_row_tile(m_rows, k_pad, c_pad, store_y, vmem_limit):
    """Largest row tile whose double-buffered working set fits the VMEM budget."""
    budget = int(vmem_limit * 0.80)                       # headroom for internal scratch
    fixed = 2 * (k_pad * c_pad * 2) + 64 * c_pad * 4 + (1 << 20)   # W dbuf + stats/scale
    if store_y:
        per_row = max(2 * (k_pad * 2) + 2 * (c_pad * 2),  # phase 1: A dbuf + bf16 Y dbuf
                      2 * (c_pad * 2) + 2 * (c_pad * 4))  # phase 2: bf16 Y dbuf + f32 out
    else:
        per_row = 2 * (k_pad * 2) + 2 * (c_pad * 4)       # phase 2: A dbuf + f32 out dbuf
    tm = (budget - fixed) // per_row if budget > fixed else 256
    tm = max(256, min(4096, int(tm)))
    tm = (tm // 256) * 256
    tm = min(tm, _round_up(m_rows, 8))
    return int(tm)


@functools.partial(jax.jit, static_argnames=("stride", "padding"))
def cnn_block_forward(x_nchw, weight, gamma, beta, *, stride=1, padding=None):
    """
    x_nchw : [N, C_in, H, W] f32
    weight : [C_out, C_in, kh, kw] f32   (Conv2d, bias=False)
    gamma, beta : [C_out] f32            (BatchNorm2d affine params)
    returns [N, C_out, Ho, Wo] f32
    """
    n, c_in, h, w = x_nchw.shape
    c_out, _, kh, kw = weight.shape
    pad = (kh - 1) // 2 if padding is None else padding

    a, h_out, w_out = im2col_nchw(x_nchw, kh, kw, stride, pad)   # [M, K]
    m_rows, k = a.shape

    k_pad = _round_up(k, 16)          # bf16 sublane packing for W
    c_pad = _round_up(c_out, 128)     # lane-dense output / MXU result columns

    # Shape-dependent recompute-vs-store: storing Y in bf16 costs ~4*M*c_pad extra HBM
    # bytes; re-streaming A in phase 2 costs 2*M*k_pad and a second matmul.
    store_y = k_pad > 2 * c_pad

    vmem_limit = _device_vmem_limit()
    tm = _pick_row_tile(m_rows, k_pad, c_pad, store_y, vmem_limit)

    n_tiles = -(-m_rows // tm)
    n_par = 2 if n_tiles >= 2 else 1         # phase-1 split across 2 TensorCores on v7x
    m_pad = _round_up(m_rows, tm * n_par)
    tiles_per_par = m_pad // (tm * n_par)
    n_tiles_total = m_pad // tm

    # bf16 matmul operands (f32 accumulation inside the kernel); zero padding is exact.
    a_p = jnp.pad(a, ((0, m_pad - m_rows), (0, k_pad - k))).astype(jnp.bfloat16)
    wmat = weight.reshape(c_out, c_in * kh * kw).T                   # [K, C_out]
    w_p = jnp.pad(wmat, ((0, k_pad - k), (0, c_pad - c_out))).astype(jnp.bfloat16)

    matmul_flops = 2 * m_pad * k_pad * c_pad
    a_bytes = m_pad * k_pad * 2
    w_bytes = k_pad * c_pad * 2
    y_bytes = m_pad * c_pad * 2
    o_bytes = m_pad * c_pad * 4

    a_spec = pl.BlockSpec((tm, k_pad), lambda p, i: (p * tiles_per_par + i, 0))
    w_spec = pl.BlockSpec((k_pad, c_pad), lambda p, i: (0, 0))       # resident across tiles
    stat_spec = pl.BlockSpec((8, c_pad), lambda p, i: (p, 0))        # resident per core slice

    cparams1 = pltpu.CompilerParams(
        dimension_semantics=("parallel", "arbitrary"),
        vmem_limit_bytes=vmem_limit)

    # ---- phase 1: conv matmul + per-channel sum / sum-of-squares (+ optional bf16 Y) ----
    if store_y:
        y_bf16, sum_out, sq_out = pl.pallas_call(
            conv_stats_store_kernel,
            out_shape=(jax.ShapeDtypeStruct((m_pad, c_pad), jnp.bfloat16),
                       jax.ShapeDtypeStruct((8 * n_par, c_pad), jnp.float32),
                       jax.ShapeDtypeStruct((8 * n_par, c_pad), jnp.float32)),
            grid=(n_par, tiles_per_par),
            in_specs=[a_spec, w_spec],
            out_specs=[pl.BlockSpec((tm, c_pad), lambda p, i: (p * tiles_per_par + i, 0)),
                       stat_spec, stat_spec],
            compiler_params=cparams1,
            cost_estimate=pl.CostEstimate(
                flops=matmul_flops, transcendentals=0,
                bytes_accessed=a_bytes + w_bytes + y_bytes),
        )(a_p, w_p)
    else:
        sum_out, sq_out = pl.pallas_call(
            conv_stats_kernel,
            out_shape=(jax.ShapeDtypeStruct((8 * n_par, c_pad), jnp.float32),
                       jax.ShapeDtypeStruct((8 * n_par, c_pad), jnp.float32)),
            grid=(n_par, tiles_per_par),
            in_specs=[a_spec, w_spec],
            out_specs=[stat_spec, stat_spec],
            compiler_params=cparams1,
            cost_estimate=pl.CostEstimate(
                flops=matmul_flops, transcendentals=0,
                bytes_accessed=a_bytes + w_bytes),
        )(a_p, w_p)

    # Fold BN into a single per-channel scale/shift (f32, hoisted out of the kernels).
    sum_tot = jnp.sum(sum_out.reshape(n_par, 8, c_pad)[:, 0, :], axis=0)
    sq_tot = jnp.sum(sq_out.reshape(n_par, 8, c_pad)[:, 0, :], axis=0)
    m_f = jnp.float32(m_rows)                               # real rows only (pad rows are 0)
    mean = sum_tot / m_f
    var = jnp.maximum(sq_tot / m_f - mean * mean, 0.0)      # clamp: cancellation safety
    inv = jax.lax.rsqrt(var + EPS)
    g = jnp.pad(gamma, (0, c_pad - c_out), constant_values=1.0)
    b = jnp.pad(beta, (0, c_pad - c_out))
    scale = (g * inv).reshape(1, c_pad).astype(jnp.float32)
    shift = (b - mean * g * inv).reshape(1, c_pad).astype(jnp.float32)

    # ---- phase 2: BN + LeakyReLU (elementwise over bf16 Y, or fused with a recompute) ----
    sc_spec = pl.BlockSpec((1, c_pad), lambda i: (0, 0))
    out_spec = pl.BlockSpec((tm, c_pad), lambda i: (i, 0))
    cparams2 = pltpu.CompilerParams(
        dimension_semantics=("parallel",),                  # rows independent -> 2 TCs on v7x
        vmem_limit_bytes=vmem_limit)

    if store_y:
        out = pl.pallas_call(
            bn_lrelu_kernel,
            out_shape=jax.ShapeDtypeStruct((m_pad, c_pad), jnp.float32),
            grid=(n_tiles_total,),
            in_specs=[pl.BlockSpec((tm, c_pad), lambda i: (i, 0)), sc_spec, sc_spec],
            out_specs=out_spec,
            compiler_params=cparams2,
            cost_estimate=pl.CostEstimate(
                flops=4 * m_pad * c_pad, transcendentals=0,
                bytes_accessed=y_bytes + o_bytes + 2 * c_pad * 4),
        )(y_bf16, scale, shift)
    else:
        out = pl.pallas_call(
            conv_bn_lrelu_kernel,
            out_shape=jax.ShapeDtypeStruct((m_pad, c_pad), jnp.float32),
            grid=(n_tiles_total,),
            in_specs=[pl.BlockSpec((tm, k_pad), lambda i: (i, 0)),
                      pl.BlockSpec((k_pad, c_pad), lambda i: (0, 0)),
                      sc_spec, sc_spec],
            out_specs=out_spec,
            compiler_params=cparams2,
            cost_estimate=pl.CostEstimate(
                flops=matmul_flops + 4 * m_pad * c_pad, transcendentals=0,
                bytes_accessed=a_bytes + w_bytes + o_bytes + 2 * c_pad * 4),
        )(a_p, w_p, scale, shift)

    # strip padding: [M_pad, C_pad] -> [N, Ho, Wo, C_out] -> NCHW
    out = out[:m_rows, :c_out].reshape(n, h_out, w_out, c_out)
    return jnp.transpose(out, (0, 3, 1, 2))


def _reference(x, weight, gamma, beta, stride, padding):
    """Pure-JAX f32 reference of Conv2d(bias=False) -> BN(batch stats) -> LeakyReLU(0.1)."""
    y = jax.lax.conv_general_dilated(
        x, weight, window_strides=(stride, stride),
        padding=[(padding, padding), (padding, padding)],
        dimension_numbers=("NCHW", "OIHW", "NCHW"))
    mean = jnp.mean(y, axis=(0, 2, 3), keepdims=True)
    var = jnp.var(y, axis=(0, 2, 3), keepdims=True)        # biased, as in training-mode BN
    z = (y - mean) * jax.lax.rsqrt(var + EPS)
    z = z * gamma.reshape(1, -1, 1, 1) + beta.reshape(1, -1, 1, 1)
    return jnp.maximum(z, NEG_SLOPE * z)


if __name__ == "__main__":
    key = jax.random.PRNGKey(0)
    k_x, k_w, k_g, k_b, k_x2, k_w2 = jax.random.split(key, 6)

    # Config 1 (small K -> recompute path), matching the module spec's typical use.
    N, C_IN, H, W = 2, 4, 16, 16
    C_OUT, KH, KW = 8, 3, 3
    x = jax.random.normal(k_x, (N, C_IN, H, W), dtype=jnp.float32)
    weight = jax.random.normal(k_w, (C_OUT, C_IN, KH, KW), dtype=jnp.float32) * 0.1
    gamma = 1.0 + 0.1 * jax.random.normal(k_g, (C_OUT,), dtype=jnp.float32)
    beta = 0.1 * jax.random.normal(k_b, (C_OUT,), dtype=jnp.float32)

    out = cnn_block_forward(x, weight, gamma, beta, stride=1, padding=1)
    jax.block_until_ready(out)
    assert out.shape == (N, C_OUT, H, W), out.shape
    assert out.dtype == jnp.float32
    ref = _reference(x, weight, gamma, beta, 1, 1)
    err = float(jnp.max(jnp.abs(out - ref)))
    assert err < 0.1, err      # bf16 matmul operands -> loose tolerance vs f32 reference

    # Config 2 (larger K -> bf16-Y store path): exercises the second code path.
    C_IN2, C_OUT2 = 32, 8
    x2 = jax.random.normal(k_x2, (N, C_IN2, H, W), dtype=jnp.float32)
    w2 = jax.random.normal(k_w2, (C_OUT2, C_IN2, KH, KW), dtype=jnp.float32) * 0.1
    out2 = cnn_block_forward(x2, w2, gamma, beta, stride=1, padding=1)
    jax.block_until_ready(out2)
    assert out2.shape == (N, C_OUT2, H, W), out2.shape
    ref2 = _reference(x2, w2, gamma, beta, 1, 1)
    err2 = float(jnp.max(jnp.abs(out2 - ref2)))
    assert err2 < 0.1, err2

    print("KERNEL_OK")
</pallas_src>

<mosaic_0001>
module attributes {stable_mosaic.version = 11 : i64} {
  func.func @conv_stats_kernel(%arg0: i32, %arg1: i32, %arg2: memref<512x48xbf16, #tpu.memory_space<vmem>>, %arg3: memref<48x128xbf16, #tpu.memory_space<vmem>>, %arg4: memref<8x128xf32, #tpu.memory_space<vmem>>, %arg5: memref<8x128xf32, #tpu.memory_space<vmem>>) attributes {dimension_semantics = [#tpu.dimension_semantics<parallel>, #tpu.dimension_semantics<arbitrary>], iteration_bounds = array<i64: 1, 1>, scalar_prefetch = 0 : i64, scratch_operands = 0 : i64, tpu.core_type = #tpu.core_type<tc>, window_params = [{transform_indices = @transform_0, window_bounds = array<i64: 512, 48>}, {pipeline_mode = #tpu.pipeline_mode<synchronous>, transform_indices = @transform_1, window_bounds = array<i64: 48, 128>}, {transform_indices = @transform_2, window_bounds = array<i64: 8, 128>}, {transform_indices = @transform_3, window_bounds = array<i64: 8, 128>}]} {
    %c0_i32 = arith.constant 0 : i32
    %0 = arith.cmpi eq, %arg1, %c0_i32 : i32
    %1 = arith.extui %0 : i1 to i32
    %c0_i32_0 = arith.constant 0 : i32
    %2 = arith.cmpi ne, %1, %c0_i32_0 : i32
    scf.if %2 {
      %cst_14 = arith.constant 0.000000e+00 : f32
      %19 = vector.broadcast %cst_14 : f32 to vector<8x128xf32>
      %c0_15 = arith.constant 0 : index
      %c0_16 = arith.constant 0 : index
      %20 = vector.load %arg4[%c0_15, %c0_16] : memref<8x128xf32, #tpu.memory_space<vmem>>, vector<8x128xf32>
      tpu.vector_store %arg4[%c0_15, %c0_16], %19 {strides = array<i32>} : memref<8x128xf32, #tpu.memory_space<vmem>>, vector<8x128xf32>,
      %cst_17 = arith.constant 0.000000e+00 : f32
      %21 = vector.broadcast %cst_17 : f32 to vector<8x128xf32>
      %c0_18 = arith.constant 0 : index
      %c0_19 = arith.constant 0 : index
      %22 = vector.load %arg5[%c0_18, %c0_19] : memref<8x128xf32, #tpu.memory_space<vmem>>, vector<8x128xf32>
      tpu.vector_store %arg5[%c0_18, %c0_19], %21 {strides = array<i32>} : memref<8x128xf32, #tpu.memory_space<vmem>>, vector<8x128xf32>,
    } else {
    }
    %c0 = arith.constant 0 : index
    %c0_1 = arith.constant 0 : index
    %3 = vector.load %arg2[%c0, %c0_1] : memref<512x48xbf16, #tpu.memory_space<vmem>>, vector<512x48xbf16>
    %c0_2 = arith.constant 0 : index
    %c0_3 = arith.constant 0 : index
    %4 = vector.load %arg3[%c0_2, %c0_3] : memref<48x128xbf16, #tpu.memory_space<vmem>>, vector<48x128xbf16>
    %cst = arith.constant dense<0.000000e+00> : vector<512x128xf32>
    %5 = tpu.matmul %3, %4, %cst {dimension_numbers = #tpu.dot_dimension_numbers<[1], [0], [0], [1], [0, 0, 1, 1], [], []>} : vector<512x48xbf16>, vector<48x128xbf16>, vector<512x128xf32> -> vector<512x128xf32>
    %c0_4 = arith.constant 0 : index
    %c0_5 = arith.constant 0 : index
    %6 = vector.load %arg4[%c0_4, %c0_5] : memref<8x128xf32, #tpu.memory_space<vmem>>, vector<8x128xf32>
    %cst_6 = arith.constant dense<0.000000e+00> : vector<128xf32>
    %7 = vector.multi_reduction <add>, %5, %cst_6 [0] : vector<512x128xf32> to vector<128xf32>
    %8 = vector.shape_cast %7 : vector<128xf32> to vector<1x128xf32>
    %9 = vector.broadcast %8 : vector<1x128xf32> to vector<8x128xf32>
    %10 = arith.addf %6, %9 : vector<8x128xf32>
    %c0_7 = arith.constant 0 : index
    %c0_8 = arith.constant 0 : index
    %11 = vector.load %arg4[%c0_7, %c0_8] : memref<8x128xf32, #tpu.memory_space<vmem>>, vector<8x128xf32>
    tpu.vector_store %arg4[%c0_7, %c0_8], %10 {strides = array<i32>} : memref<8x128xf32, #tpu.memory_space<vmem>>, vector<8x128xf32>,
    %c0_9 = arith.constant 0 : index
    %c0_10 = arith.constant 0 : index
    %12 = vector.load %arg5[%c0_9, %c0_10] : memref<8x128xf32, #tpu.memory_space<vmem>>, vector<8x128xf32>
    %13 = arith.mulf %5, %5 : vector<512x128xf32>
    %cst_11 = arith.constant dense<0.000000e+00> : vector<128xf32>
    %14 = vector.multi_reduction <add>, %13, %cst_11 [0] : vector<512x128xf32> to vector<128xf32>
    %15 = vector.shape_cast %14 : vector<128xf32> to vector<1x128xf32>
    %16 = vector.broadcast %15 : vector<1x128xf32> to vector<8x128xf32>
    %17 = arith.addf %12, %16 : vector<8x128xf32>
    %c0_12 = arith.constant 0 : index
    %c0_13 = arith.constant 0 : index
    %18 = vector.load %arg5[%c0_12, %c0_13] : memref<8x128xf32, #tpu.memory_space<vmem>>, vector<8x128xf32>
    tpu.vector_store %arg5[%c0_12, %c0_13], %17 {strides = array<i32>} : memref<8x128xf32, #tpu.memory_space<vmem>>, vector<8x128xf32>,
    return
  }
  func.func @transform_0(%arg0: i32, %arg1: i32) -> (i32, i32) {
    %c1_i32 = arith.constant 1 : i32
    %0 = arith.muli %arg0, %c1_i32 : i32
    %1 = arith.addi %0, %arg1 : i32
    %c0_i32 = arith.constant 0 : i32
    %c0_i32_0 = arith.constant 0 : i32
    return %1, %c0_i32 : i32, i32
  }
  func.func @transform_1(%arg0: i32, %arg1: i32) -> (i32, i32) {
    %c0_i32 = arith.constant 0 : i32
    %c0_i32_0 = arith.constant 0 : i32
    %c0_i32_1 = arith.constant 0 : i32
    return %c0_i32, %c0_i32_0 : i32, i32
  }
  func.func @transform_2(%arg0: i32, %arg1: i32) -> (i32, i32) {
    %c0_i32 = arith.constant 0 : i32
    %c0_i32_0 = arith.constant 0 : i32
    return %arg0, %c0_i32 : i32, i32
  }
  func.func @transform_3(%arg0: i32, %arg1: i32) -> (i32, i32) {
    %c0_i32 = arith.constant 0 : i32
    %c0_i32_0 = arith.constant 0 : i32
    return %arg0, %c0_i32 : i32, i32
  }
}

module attributes {stable_mosaic.version = 11 : i64} {
  func.func @conv_bn_lrelu_kernel(%arg0: i32, %arg1: memref<512x48xbf16, #tpu.memory_space<vmem>>, %arg2: memref<48x128xbf16, #tpu.memory_space<vmem>>, %arg3: memref<1x128xf32, #tpu.memory_space<vmem>>, %arg4: memref<1x128xf32, #tpu.memory_space<vmem>>, %arg5: memref<512x128xf32, #tpu.memory_space<vmem>>) attributes {dimension_semantics = [#tpu.dimension_semantics<parallel>], iteration_bounds = array<i64: 1>, scalar_prefetch = 0 : i64, scratch_operands = 0 : i64, tpu.core_type = #tpu.core_type<tc>, window_params = [{transform_indices = @transform_0, window_bounds = array<i64: 512, 48>}, {pipeline_mode = #tpu.pipeline_mode<synchronous>, transform_indices = @transform_1, window_bounds = array<i64: 48, 128>}, {pipeline_mode = #tpu.pipeline_mode<synchronous>, transform_indices = @transform_2, window_bounds = array<i64: 1, 128>}, {pipeline_mode = #tpu.pipeline_mode<synchronous>, transform_indices = @transform_3, window_bounds = array<i64: 1, 128>}, {transform_indices = @transform_4, window_bounds = array<i64: 512, 128>}]} {
    %c0 = arith.constant 0 : index
    %c0_0 = arith.constant 0 : index
    %0 = vector.load %arg1[%c0, %c0_0] : memref<512x48xbf16, #tpu.memory_space<vmem>>, vector<512x48xbf16>
    %c0_1 = arith.constant 0 : index
    %c0_2 = arith.constant 0 : index
    %1 = vector.load %arg2[%c0_1, %c0_2] : memref<48x128xbf16, #tpu.memory_space<vmem>>, vector<48x128xbf16>
    %cst = arith.constant dense<0.000000e+00> : vector<512x128xf32>
    %2 = tpu.matmul %0, %1, %cst {dimension_numbers = #tpu.dot_dimension_numbers<[1], [0], [0], [1], [0, 0, 1, 1], [], []>} : vector<512x48xbf16>, vector<48x128xbf16>, vector<512x128xf32> -> vector<512x128xf32>
    %c0_3 = arith.constant 0 : index
    %c0_4 = arith.constant 0 : index
    %3 = vector.load %arg3[%c0_3, %c0_4] : memref<1x128xf32, #tpu.memory_space<vmem>>, vector<1x128xf32>
    %4 = vector.broadcast %3 : vector<1x128xf32> to vector<512x128xf32>
    %5 = arith.mulf %2, %4 : vector<512x128xf32>
    %c0_5 = arith.constant 0 : index
    %c0_6 = arith.constant 0 : index
    %6 = vector.load %arg4[%c0_5, %c0_6] : memref<1x128xf32, #tpu.memory_space<vmem>>, vector<1x128xf32>
    %7 = vector.broadcast %6 : vector<1x128xf32> to vector<512x128xf32>
    %8 = arith.addf %5, %7 : vector<512x128xf32>
    %cst_7 = arith.constant 1.000000e-01 : f32
    %9 = vector.broadcast %cst_7 : f32 to vector<512x128xf32>
    %10 = arith.mulf %9, %8 : vector<512x128xf32>
    %11 = arith.maximumf %8, %10 : vector<512x128xf32>
    %c0_8 = arith.constant 0 : index
    %c0_9 = arith.constant 0 : index
    %12 = vector.load %arg5[%c0_8, %c0_9] : memref<512x128xf32, #tpu.memory_space<vmem>>, vector<512x128xf32>
    tpu.vector_store %arg5[%c0_8, %c0_9], %11 {strides = array<i32>} : memref<512x128xf32, #tpu.memory_space<vmem>>, vector<512x128xf32>,
    return
  }
  func.func @transform_0(%arg0: i32) -> (i32, i32) {
    %c0_i32 = arith.constant 0 : i32
    %c0_i32_0 = arith.constant 0 : i32
    return %arg0, %c0_i32 : i32, i32
  }
  func.func @transform_1(%arg0: i32) -> (i32, i32) {
    %c0_i32 = arith.constant 0 : i32
    %c0_i32_0 = arith.constant 0 : i32
    %c0_i32_1 = arith.constant 0 : i32
    return %c0_i32, %c0_i32_0 : i32, i32
  }
  func.func @transform_2(%arg0: i32) -> (i32, i32) {
    %c0_i32 = arith.constant 0 : i32
    %c0_i32_0 = arith.constant 0 : i32
    %c0_i32_1 = arith.constant 0 : i32
    return %c0_i32, %c0_i32_0 : i32, i32
  }
  func.func @transform_3(%arg0: i32) -> (i32, i32) {
    %c0_i32 = arith.constant 0 : i32
    %c0_i32_0 = arith.constant 0 : i32
    %c0_i32_1 = arith.constant 0 : i32
    return %c0_i32, %c0_i32_0 : i32, i32
  }
  func.func @transform_4(%arg0: i32) -> (i32, i32) {
    %c0_i32 = arith.constant 0 : i32
    %c0_i32_0 = arith.constant 0 : i32
    return %arg0, %c0_i32 : i32, i32
  }
}

</mosaic_0001>

<bundles_post_ra>
// kernel: cnn_block_forward.2
= control target key start
LH: loop header
LB: loop body
LE: loop exit
PB: predicated region body
PF: predicated region fallthrough
CT: control target
= control target key end

     0   :  { %vm290_vm0 = vcmask 392192   ;;  %s1355_s1 = inlined_call_operand.vmem [shape: bf16[48,128], index: 1, kind: input, shape index: {}]   ;;  %s1356_s0 = inlined_call_operand.vmem [shape: bf16[512,48], index: 0, kind: input, shape index: {}]   ;;  %s1357_s2 = inlined_call_operand.vmem [shape: f32[8,128], index: 2, kind: output, shape index: {0}]   ;;  %s1358_s3 = inlined_call_operand.vmem [shape: f32[8,128], index: 3, kind: output, shape index: {1}]  }
   0x1   :  { %v1077_v0 = vld [vmem:[%s1355_s1 + $0x10] sm:$0xff]   ;;  %v1078_v1 = vld [vmem:[%s1355_s1 + $0x8] sm:$0xff]   ;;  %v1080_v2 = vld [vmem:[%s1356_s0] sm:$0xff]  }
   0x2   :  { %1000 = vmatprep.subr.bf16.mxu0 %v1077_v0  ;;  %1070 = vmatprep.subr.bf16.mxu1 %v1077_v0  ;;  %v1079_v3 = vld [vmem:[%s1355_s1] sm:$0xff]   ;;  %v1081_v4 = vld [vmem:[%s1356_s0 + $0x8] sm:$0xff]   ;;  %v1082_v5 = vld [vmem:[%s1356_s0 + $0x10] sm:$0xff]  }
   0x3   :  { %1001 = vmatpush3.bf16.msra.mxu0 %v1077_v0  ;;  %1073 = vmatpush3.bf16.msra.mxu1 %v1077_v0  ;;  %v1083_v6 = vld [vmem:[%s1356_s0 + $0x18] sm:$0xff]   ;;  %v1084_v7 = vld [vmem:[%s1356_s0 + $0x20] sm:$0xff]   ;;  %v1097_v9 = vld [vmem:[%s1356_s0 + $0x88] sm:$0xff]  }
   0x4   :  { %1002 = vmatprep.subr.bf16.mxu0 %v1078_v1  ;;  %1071 = vmatprep.subr.bf16.mxu1 %v1078_v1  ;;  %v1096_v8 = vld [vmem:[%s1356_s0 + $0x80] sm:$0xff]   ;;  %v1098_v10 = vld [vmem:[%s1356_s0 + $0x90] sm:$0xff]   ;;  %v1085_v11 = vld [vmem:[%s1356_s0 + $0x28] sm:$0xff]  }
   0x5   :  { %1006 = vmatprep.mubr.msk.bf16.mxu0 %vm290_vm0, %v1080_v2  ;;  %1038 = vmatprep.mubr.msk.bf16.mxu1 %vm290_vm0, %v1096_v8  ;;  %v1086_v12 = vld [vmem:[%s1356_s0 + $0x30] sm:$0xff]   ;;  %v1099_v13 = vld [vmem:[%s1356_s0 + $0x98] sm:$0xff]   ;;  %v1100_v14 = vld [vmem:[%s1356_s0 + $0xa0] sm:$0xff]  }
   0x6   :  { %v1087_v15 = vld [vmem:[%s1356_s0 + $0x38] sm:$0xff]   ;;  %v1101_v16 = vld [vmem:[%s1356_s0 + $0xa8] sm:$0xff]   ;;  %v1088_v17 = vld [vmem:[%s1356_s0 + $0x40] sm:$0xff]  }
   0x7   :  { %1003 = vmatpush3.bf16.msra.mxu0 %v1078_v1  ;;  %1074 = vmatpush3.bf16.msra.mxu1 %v1078_v1  ;;  %v1102_v18 = vld [vmem:[%s1356_s0 + $0xb0] sm:$0xff]   ;;  %v1089_v19 = vld [vmem:[%s1356_s0 + $0x48] sm:$0xff]   ;;  %v1103_v20 = vld [vmem:[%s1356_s0 + $0xb8] sm:$0xff]  }
   0x8   :  { %1004 = vmatprep.subr.bf16.mxu0 %v1079_v3  ;;  %1072 = vmatprep.subr.bf16.mxu1 %v1079_v3  ;;  %v1090_v21 = vld [vmem:[%s1356_s0 + $0x50] sm:$0xff]   ;;  %v1104_v22 = vld [vmem:[%s1356_s0 + $0xc0] sm:$0xff]   ;;  %v1091_v23 = vld [vmem:[%s1356_s0 + $0x58] sm:$0xff]  }
   0x9   :  { %v1105_v24 = vld [vmem:[%s1356_s0 + $0xc8] sm:$0xff]   ;;  %v1092_v25 = vld [vmem:[%s1356_s0 + $0x60] sm:$0xff]   ;;  %v1106_v26 = vld [vmem:[%s1356_s0 + $0xd0] sm:$0xff]  }
   0xa   :  { %v1093_v27 = vld [vmem:[%s1356_s0 + $0x68] sm:$0xff]   ;;  %v1107_v28 = vld [vmem:[%s1356_s0 + $0xd8] sm:$0xff]   ;;  %v1094_v29 = vld [vmem:[%s1356_s0 + $0x70] sm:$0xff]  }
   0xb   :  { %1005 = vmatpush3.bf16.msra.mxu0 %v1079_v3  ;;  %1075 = vmatpush3.bf16.msra.mxu1 %v1079_v3  ;;  %v1108_v30 = vld [vmem:[%s1356_s0 + $0xe0] sm:$0xff]   ;;  %v1095_v31 = vld [vmem:[%s1356_s0 + $0x78] sm:$0xff]   ;;  %v1109_v32 = vld [vmem:[%s1356_s0 + $0xe8] sm:$0xff]  }
   0xc   :  { %v1110_v33 = vld [vmem:[%s1356_s0 + $0xf0] sm:$0xff]   ;;  %v1111_v34 = vld [vmem:[%s1356_s0 + $0xf8] sm:$0xff]  }
   0xe   :  { %1007 = vmatmul.mubr.msk.bf16.vlgmr.msra.gmra.mxu0 %vm290_vm0, %v1081_v4  ;;  %1039 = vmatmul.mubr.msk.bf16.vlgmr.msra.gmra.mxu1 %vm290_vm0, %v1097_v9 }
   0xf   :  { %1010 = vmatprep.mubr.msk.bf16.mxu0 %vm290_vm0, %v1082_v5  ;;  %1042 = vmatprep.mubr.msk.bf16.mxu1 %vm290_vm0, %v1098_v10 }
  0x16   :  { %1011 = vmatmul.mubr.msk.bf16.gmra.mxu0 %vm290_vm0, %v1083_v6  ;;  %1043 = vmatmul.mubr.msk.bf16.gmra.mxu1 %vm290_vm0, %v1099_v13 }
  0x17   :  { %1014 = vmatprep.mubr.msk.bf16.mxu0 %vm290_vm0, %v1084_v7  ;;  %1046 = vmatprep.mubr.msk.bf16.mxu1 %vm290_vm0, %v1100_v14 }
  0x1e   :  { %1015 = vmatmul.mubr.msk.bf16.gmra.mxu0 %vm290_vm0, %v1085_v11  ;;  %1047 = vmatmul.mubr.msk.bf16.gmra.mxu1 %vm290_vm0, %v1101_v16 }
  0x1f   :  { %1018 = vmatprep.mubr.msk.bf16.mxu0 %vm290_vm0, %v1086_v12  ;;  %1050 = vmatprep.mubr.msk.bf16.mxu1 %vm290_vm0, %v1102_v18 }
  0x26   :  { %1019 = vmatmul.mubr.msk.bf16.gmra.mxu0 %vm290_vm0, %v1087_v15  ;;  %1051 = vmatmul.mubr.msk.bf16.gmra.mxu1 %vm290_vm0, %v1103_v20 }
  0x27   :  { %1022 = vmatprep.mubr.msk.bf16.mxu0 %vm290_vm0, %v1088_v17  ;;  %1054 = vmatprep.mubr.msk.bf16.mxu1 %vm290_vm0, %v1104_v22 }
  0x2e   :  { %1023 = vmatmul.mubr.msk.bf16.gmra.mxu0 %vm290_vm0, %v1089_v19  ;;  %1055 = vmatmul.mubr.msk.bf16.gmra.mxu1 %vm290_vm0, %v1105_v24 }
  0x2f   :  { %1026 = vmatprep.mubr.msk.bf16.mxu0 %vm290_vm0, %v1090_v21  ;;  %1058 = vmatprep.mubr.msk.bf16.mxu1 %vm290_vm0, %v1106_v26 }
  0x36   :  { %1027 = vmatmul.mubr.msk.bf16.gmra.mxu0 %vm290_vm0, %v1091_v23  ;;  %1059 = vmatmul.mubr.msk.bf16.gmra.mxu1 %vm290_vm0, %v1107_v28 }
  0x37   :  { %1030 = vmatprep.mubr.msk.bf16.mxu0 %vm290_vm0, %v1092_v25  ;;  %1062 = vmatprep.mubr.msk.bf16.mxu1 %vm290_vm0, %v1108_v30 }
  0x3e   :  { %1031 = vmatmul.mubr.msk.bf16.gmra.mxu0 %vm290_vm0, %v1093_v27  ;;  %1063 = vmatmul.mubr.msk.bf16.gmra.mxu1 %vm290_vm0, %v1109_v32 }
  0x3f   :  { %1034 = vmatprep.mubr.msk.bf16.mxu0 %vm290_vm0, %v1094_v29  ;;  %1066 = vmatprep.mubr.msk.bf16.mxu1 %vm290_vm0, %v1110_v33 }
  0x46   :  { %1035 = vmatmul.mubr.msk.bf16.gmra.mxu0 %vm290_vm0, %v1095_v31  ;;  %1067 = vmatmul.mubr.msk.bf16.gmra.mxu1 %vm290_vm0, %v1111_v34 }
  0xce   :  { %v1008_v35 = vpop.f32.mrf.mxu0  ;;  %v1269_v43 = vpop.f32.mrf.mxu1 }
  0xcf   :  { %v751_v44 = vmul.f32 %v1008_v35, %v1008_v35 }
  0xd0   :  { %v421_v36 = vpop.f32.mrf.mxu0  ;;  %v1271_v48 = vpop.f32.mrf.mxu1 }
  0xd1   :  { %v749_v39 = vmul.f32 %v421_v36, %v421_v36 }
  0xd2   :  { %v1009_v37 = vpop.f32.mrf.mxu0  ;;  %v1273_v53 = vpop.f32.mrf.mxu1 }
  0xd3   :  { %v752_v49 = vmul.f32 %v1009_v37, %v1009_v37 }
  0xd4   :  { %v424_v38 = vpop.f32.mrf.mxu0  ;;  %v1275_v58 = vpop.f32.mrf.mxu1 }
  0xd5   :  { %v677_v40 = vadd.f32 %v424_v38, %v421_v36  ;;  %v750_v41 = vmul.f32 %v424_v38, %v424_v38 }
  0xd6   :  { %v1012_v42 = vpop.f32.mrf.mxu0  ;;  %v1277_v63 = vpop.f32.mrf.mxu1 }
  0xd7   :  { %v678_v45 = vadd.f32 %v1008_v35, %v677_v40  ;;  %v813_v46 = vadd.f32 %v750_v41, %v749_v39  ;;  %v755_v0 = vmul.f32 %v1012_v42, %v1012_v42 }
  0xd8   :  { %v437_v47 = vpop.f32.mrf.mxu0  ;;  %v1279_v8 = vpop.f32.mrf.mxu1 }
  0xd9   :  { %v814_v50 = vadd.f32 %v813_v46, %v751_v44  ;;  %v679_v51 = vadd.f32 %v1009_v37, %v678_v45  ;;  %v753_v55 = vmul.f32 %v437_v47, %v437_v47 }
  0xda   :  { %v1013_v52 = vpop.f32.mrf.mxu0  ;;  %v1281_v17 = vpop.f32.mrf.mxu1 }
  0xdb   :  { %v680_v54 = vadd.f32 %v679_v51, %v437_v47  ;;  %v815_v56 = vadd.f32 %v814_v50, %v752_v49  ;;  %v756_v4 = vmul.f32 %v1013_v52, %v1013_v52 }
  0xdc   :  { %v440_v57 = vpop.f32.mrf.mxu0  ;;  %v1283_v26 = vpop.f32.mrf.mxu1 }
  0xdd   :  { %v816_v59 = vadd.f32 %v815_v56, %v753_v55  ;;  %v681_v60 = vadd.f32 %v680_v54, %v440_v57  ;;  %v754_v61 = vmul.f32 %v440_v57, %v440_v57 }
  0xde   :  { %v1016_v62 = vpop.f32.mrf.mxu0  ;;  %v1285_v35 = vpop.f32.mrf.mxu1 }
  0xdf   :  { %v682_v1 = vadd.f32 %v1012_v42, %v681_v60  ;;  %v817_v2 = vadd.f32 %v816_v59, %v754_v61  ;;  %v759_v18 = vmul.f32 %v1016_v62, %v1016_v62 }
  0xe0   :  { %v453_v3 = vpop.f32.mrf.mxu0  ;;  %v1287_v45 = vpop.f32.mrf.mxu1 }
  0xe1   :  { %v818_v5 = vadd.f32 %v817_v2, %v755_v0  ;;  %v683_v6 = vadd.f32 %v1013_v52, %v682_v1  ;;  %v757_v10 = vmul.f32 %v453_v3, %v453_v3 }
  0xe2   :  { %v1017_v7 = vpop.f32.mrf.mxu0  ;;  %v1289_v56 = vpop.f32.mrf.mxu1 }
  0xe3   :  { %v684_v9 = vadd.f32 %v683_v6, %v453_v3  ;;  %v819_v11 = vadd.f32 %v818_v5, %v756_v4  ;;  %v760_v22 = vmul.f32 %v1017_v7, %v1017_v7 }
  0xe4   :  { %v456_v12 = vpop.f32.mrf.mxu0  ;;  %v1291_v3 = vpop.f32.mrf.mxu1 }
  0xe5   :  { %v820_v13 = vadd.f32 %v819_v11, %v757_v10  ;;  %v685_v14 = vadd.f32 %v684_v9, %v456_v12  ;;  %v758_v15 = vmul.f32 %v456_v12, %v456_v12 }
  0xe6   :  { %v1020_v16 = vpop.f32.mrf.mxu0 }
  0xe7   :  { %v686_v19 = vadd.f32 %v1016_v62, %v685_v14  ;;  %v821_v20 = vadd.f32 %v820_v13, %v758_v15  ;;  %v763_v36 = vmul.f32 %v1020_v16, %v1020_v16  ;;  %v1293_v13 = vpop.f32.mrf.mxu1 }
  0xe8   :  { %v469_v21 = vpop.f32.mrf.mxu0 }
  0xe9   :  { %v822_v23 = vadd.f32 %v821_v20, %v759_v18  ;;  %v687_v24 = vadd.f32 %v1017_v7, %v686_v19  ;;  %v761_v28 = vmul.f32 %v469_v21, %v469_v21 }
  0xea   :  { %v1021_v25 = vpop.f32.mrf.mxu0 }
  0xeb   :  { %v688_v27 = vadd.f32 %v687_v24, %v469_v21  ;;  %v823_v29 = vadd.f32 %v822_v23, %v760_v22  ;;  %v764_v40 = vmul.f32 %v1021_v25, %v1021_v25  ;;  %v1295_v23 = vpop.f32.mrf.mxu1 }
  0xec   :  { %v472_v30 = vpop.f32.mrf.mxu0 }
  0xed   :  { %v824_v31 = vadd.f32 %v823_v29, %v761_v28  ;;  %v689_v32 = vadd.f32 %v688_v27, %v472_v30  ;;  %v762_v33 = vmul.f32 %v472_v30, %v472_v30 }
  0xee   :  { %v1024_v34 = vpop.f32.mrf.mxu0 }
  0xef   :  { %v690_v37 = vadd.f32 %v1020_v16, %v689_v32  ;;  %v825_v38 = vadd.f32 %v824_v31, %v762_v33  ;;  %v767_v57 = vmul.f32 %v1024_v34, %v1024_v34  ;;  %v1297_v33 = vpop.f32.mrf.mxu1 }
  0xf0   :  { %v485_v39 = vpop.f32.mrf.mxu0 }
  0xf1   :  { %v826_v41 = vadd.f32 %v825_v38, %v763_v36  ;;  %v691_v42 = vadd.f32 %v1021_v25, %v690_v37  ;;  %v765_v47 = vmul.f32 %v485_v39, %v485_v39 }
  0xf2   :  { %v1025_v44 = vpop.f32.mrf.mxu0 }
  0xf3   :  { %v692_v46 = vadd.f32 %v691_v42, %v485_v39  ;;  %v827_v49 = vadd.f32 %v826_v41, %v764_v40  ;;  %v768_v62 = vmul.f32 %v1025_v44, %v1025_v44 }
  0xf4   :  { %v488_v50 = vpop.f32.mrf.mxu0 }
  0xf5   :  { %v828_v51 = vadd.f32 %v827_v49, %v765_v47  ;;  %v693_v52 = vadd.f32 %v692_v46, %v488_v50  ;;  %v766_v54 = vmul.f32 %v488_v50, %v488_v50 }
  0xf6   :  { %v1028_v55 = vpop.f32.mrf.mxu0 }
  0xf7   :  { %v694_v59 = vadd.f32 %v1024_v34, %v693_v52  ;;  %v829_v60 = vadd.f32 %v828_v51, %v766_v54  ;;  %v771_v14 = vmul.f32 %v1028_v55, %v1028_v55 }
  0xf8   :  { %v501_v61 = vpop.f32.mrf.mxu0 }
  0xf9   :  { %v830_v0 = vadd.f32 %v829_v60, %v767_v57  ;;  %v695_v1 = vadd.f32 %v1025_v44, %v694_v59  ;;  %v769_v5 = vmul.f32 %v501_v61, %v501_v61  ;;  %v600_v44 = vpop.f32.mrf.mxu1 }
  0xfa   :  { %v1029_v2 = vpop.f32.mrf.mxu0 }
  0xfb   :  { %v696_v4 = vadd.f32 %v695_v1, %v501_v61  ;;  %v831_v6 = vadd.f32 %v830_v0, %v768_v62  ;;  %v772_v19 = vmul.f32 %v1029_v2, %v1029_v2 }
  0xfc   :  { %v504_v7 = vpop.f32.mrf.mxu0 }
  0xfd   :  { %v832_v9 = vadd.f32 %v831_v6, %v769_v5  ;;  %v697_v10 = vadd.f32 %v696_v4, %v504_v7  ;;  %v770_v11 = vmul.f32 %v504_v7, %v504_v7  ;;  %v782_v7 = vmul.f32 %v1275_v58, %v1275_v58 }
  0xfe   :  { %v1032_v12 = vpop.f32.mrf.mxu0 }
  0xff   :  { %v698_v15 = vadd.f32 %v1028_v55, %v697_v10  ;;  %v833_v16 = vadd.f32 %v832_v9, %v770_v11  ;;  %v775_v34 = vmul.f32 %v1032_v12, %v1032_v12  ;;  %v1299_v55 = vpop.f32.mrf.mxu1  ;;  %v783_v11 = vmul.f32 %v1269_v43, %v1269_v43 }
 0x100   :  { %v517_v18 = vpop.f32.mrf.mxu0 }
 0x101   :  { %v834_v20 = vadd.f32 %v833_v16, %v771_v14  ;;  %v699_v21 = vadd.f32 %v1029_v2, %v698_v15  ;;  %v773_v25 = vmul.f32 %v517_v18, %v517_v18  ;;  %v613_v1 = vpop.f32.mrf.mxu1  ;;  %v781_v2 = vmul.f32 %v1271_v48, %v1271_v48 }
 0x102   :  { %v1033_v22 = vpop.f32.mrf.mxu0  ;;  %v784_v15 = vmul.f32 %v1273_v53, %v1273_v53 }
 0x103   :  { %v700_v24 = vadd.f32 %v699_v21, %v517_v18  ;;  %v835_v27 = vadd.f32 %v834_v20, %v772_v19  ;;  %v776_v39 = vmul.f32 %v1033_v22, %v1033_v22  ;;  %v1057_v10 = vpop.f32.mrf.mxu1 }
 0x104   :  { %v520_v28 = vpop.f32.mrf.mxu0 }
 0x105   :  { %v836_v29 = vadd.f32 %v835_v27, %v773_v25  ;;  %v701_v30 = vadd.f32 %v700_v24, %v520_v28  ;;  %v774_v31 = vmul.f32 %v520_v28, %v520_v28  ;;  %v787_v25 = vmul.f32 %v1277_v63, %v1277_v63 }
 0x106   :  { %v1036_v32 = vpop.f32.mrf.mxu0  ;;  %v788_v28 = vmul.f32 %v1281_v17, %v1281_v17 }
 0x107   :  { %v702_v36 = vadd.f32 %v1032_v12, %v701_v30  ;;  %v837_v37 = vadd.f32 %v836_v29, %v774_v31  ;;  %v779_v57 = vmul.f32 %v1036_v32, %v1036_v32 }
 0x108   :  { %v533_v38 = vpop.f32.mrf.mxu0 }
 0x109   :  { %v838_v40 = vadd.f32 %v837_v37, %v775_v34  ;;  %v703_v41 = vadd.f32 %v1033_v22, %v702_v36  ;;  %v777_v47 = vmul.f32 %v533_v38, %v533_v38 }
 0x10a   :  { %v1037_v42 = vpop.f32.mrf.mxu0 }
 0x10b   :  { %v704_v46 = vadd.f32 %v703_v41, %v533_v38  ;;  %v839_v49 = vadd.f32 %v838_v40, %v776_v39  ;;  %v780_v61 = vmul.f32 %v1037_v42, %v1037_v42  ;;  %v791_v38 = vmul.f32 %v1285_v35, %v1285_v35 }
 0x10c   :  { %v536_v50 = vpop.f32.mrf.mxu0  ;;  %v792_v40 = vmul.f32 %v1289_v56, %v1289_v56 }
 0x10d   :  { %v840_v51 = vadd.f32 %v839_v49, %v777_v47  ;;  %v705_v52 = vadd.f32 %v704_v46, %v536_v50  ;;  %v778_v54 = vmul.f32 %v536_v50, %v536_v50  ;;  %v793_v47 = vmul.f32 %v1295_v23, %v1295_v23 }
 0x10f   :  { %v706_v59 = vadd.f32 %v1036_v32, %v705_v52  ;;  %v841_v60 = vadd.f32 %v840_v51, %v778_v54  ;;  %v789_v32 = vmul.f32 %v1287_v45, %v1287_v45  ;;  %v794_v51 = vmul.f32 %v600_v44, %v600_v44 }
 0x111   :  { %v707_v62 = vadd.f32 %v1037_v42, %v706_v59  ;;  %v842_v0 = vadd.f32 %v841_v60, %v779_v57 }
 0x113   :  { %v843_v4 = vadd.f32 %v842_v0, %v780_v61  ;;  %v708_v5 = vadd.f32 %v707_v62, %v1271_v48  ;;  %v616_v48 = vpop.f32.mrf.mxu1 }
 0x115   :  { %v709_v6 = vadd.f32 %v708_v5, %v1275_v58  ;;  %v844_v9 = vadd.f32 %v843_v4, %v781_v2  ;;  %v785_v58 = vmul.f32 %v1279_v8, %v1279_v8  ;;  %v1060_v24 = vpop.f32.mrf.mxu1 }
 0x117   :  { %v710_v12 = vadd.f32 %v1269_v43, %v709_v6  ;;  %v845_v14 = vadd.f32 %v844_v9, %v782_v7  ;;  %v786_v43 = vmul.f32 %v1283_v26, %v1283_v26  ;;  %v629_v30 = vpop.f32.mrf.mxu1  ;;  %v799_v6 = vmul.f32 %v1299_v55, %v1299_v55 }
 0x118   :  { %v800_v9 = vmul.f32 %v1057_v10, %v1057_v10 }
 0x119   :  { %v846_v16 = vadd.f32 %v845_v14, %v783_v11  ;;  %v711_v18 = vadd.f32 %v1273_v53, %v710_v12  ;;  %v1061_v37 = vpop.f32.mrf.mxu1 }
 0x11b   :  { %v712_v19 = vadd.f32 %v711_v18, %v1279_v8  ;;  %v847_v20 = vadd.f32 %v846_v16, %v784_v15  ;;  %v632_v42 = vpop.f32.mrf.mxu1 }
 0x11d   :  { %v848_v21 = vadd.f32 %v847_v20, %v785_v58  ;;  %v713_v22 = vadd.f32 %v712_v19, %v1283_v26  ;;  %v1064_v52 = vpop.f32.mrf.mxu1  ;;  %v802_v19 = vmul.f32 %v632_v42, %v632_v42  ;;  %v803_v20 = vmul.f32 %v1060_v24, %v1060_v24 }
 0x11f   :  { %v714_v27 = vadd.f32 %v1277_v63, %v713_v22  ;;  %v849_v53 = vadd.f32 %v848_v21, %v786_v43  ;;  %v790_v63 = vmul.f32 %v1291_v3, %v1291_v3  ;;  %v645_v61 = vpop.f32.mrf.mxu1  ;;  %v804_v22 = vmul.f32 %v1061_v37, %v1061_v37 }
 0x121   :  { %v850_v29 = vadd.f32 %v849_v53, %v787_v25  ;;  %v715_v8 = vadd.f32 %v1281_v17, %v714_v27  ;;  %v1065_v5 = vpop.f32.mrf.mxu1  ;;  %v805_v53 = vmul.f32 %v645_v61, %v645_v61 }
 0x123   :  { %v716_v31 = vadd.f32 %v715_v8, %v1287_v45  ;;  %v851_v26 = vadd.f32 %v850_v29, %v788_v28  ;;  %v648_v14 = vpop.f32.mrf.mxu1 }
 0x124   :  { %v806_v8 = vmul.f32 %v648_v14, %v648_v14 }
 0x125   :  { %v852_v34 = vadd.f32 %v851_v26, %v789_v32  ;;  %v717_v36 = vadd.f32 %v716_v31, %v1291_v3  ;;  %v1068_v58 = vpop.f32.mrf.mxu1 }
 0x127   :  { %v718_v39 = vadd.f32 %v1285_v35, %v717_v36  ;;  %v853_v17 = vadd.f32 %v852_v34, %v790_v63  ;;  %v795_v35 = vmul.f32 %v1293_v13, %v1293_v13  ;;  %v661_v27 = vpop.f32.mrf.mxu1  ;;  %v808_v34 = vmul.f32 %v1065_v5, %v1065_v5 }
 0x129   :  { %v854_v41 = vadd.f32 %v853_v17, %v791_v38  ;;  %v719_v45 = vadd.f32 %v1289_v56, %v718_v39  ;;  %v796_v56 = vmul.f32 %v1297_v33, %v1297_v33  ;;  %v1069_v31 = vpop.f32.mrf.mxu1  ;;  %v809_v39 = vmul.f32 %v661_v27, %v661_v27 }
 0x12b   :  { %v720_v46 = vadd.f32 %v719_v45, %v1295_v23  ;;  %v855_v3 = vadd.f32 %v854_v41, %v792_v40  ;;  %v797_v23 = vmul.f32 %v613_v1, %v613_v1  ;;  %v664_v38 = vpop.f32.mrf.mxu1  ;;  %v811_v45 = vmul.f32 %v1068_v58, %v1068_v58 }
 0x12c   :  { %v810_v41 = vmul.f32 %v664_v38, %v664_v38 }
 0x12d   :  { %v856_v49 = vadd.f32 %v855_v3, %v793_v47  ;;  %v721_v50 = vadd.f32 %v720_v46, %v600_v44  ;;  %v798_v44 = vmul.f32 %v616_v48, %v616_v48  ;;  %v812_v47 = vmul.f32 %v1069_v31, %v1069_v31 }
 0x12f   :  { %v722_v54 = vadd.f32 %v1293_v13, %v721_v50  ;;  %v857_v57 = vadd.f32 %v856_v49, %v794_v51 }
 0x131   :  { %v858_v59 = vadd.f32 %v857_v57, %v795_v35  ;;  %v723_v60 = vadd.f32 %v1297_v33, %v722_v54  ;;  %v801_v33 = vmul.f32 %v629_v30, %v629_v30 }
 0x133   :  { %v724_v62 = vadd.f32 %v723_v60, %v613_v1  ;;  %v859_v0 = vadd.f32 %v858_v59, %v796_v56 }
 0x135   :  { %v860_v2 = vadd.f32 %v859_v0, %v797_v23  ;;  %v725_v4 = vadd.f32 %v724_v62, %v616_v48 }
 0x137   :  { %v726_v13 = vadd.f32 %v1299_v55, %v725_v4  ;;  %v861_v7 = vadd.f32 %v860_v2, %v798_v44 }
 0x139   :  { %v862_v11 = vadd.f32 %v861_v7, %v799_v6  ;;  %v727_v12 = vadd.f32 %v1057_v10, %v726_v13 }
 0x13b   :  { %v728_v15 = vadd.f32 %v727_v12, %v629_v30  ;;  %v863_v16 = vadd.f32 %v862_v11, %v800_v9  ;;  %v807_v30 = vmul.f32 %v1064_v52, %v1064_v52 }
 0x13d   :  { %v864_v18 = vadd.f32 %v863_v16, %v801_v33  ;;  %v729_v1 = vadd.f32 %v728_v15, %v632_v42 }
 0x13f   :  { %v730_v48 = vadd.f32 %v1060_v24, %v729_v1  ;;  %v865_v21 = vadd.f32 %v864_v18, %v802_v19 }
 0x141   :  { %v866_v43 = vadd.f32 %v865_v21, %v803_v20  ;;  %v731_v25 = vadd.f32 %v1061_v37, %v730_v48 }
 0x143   :  { %v732_v55 = vadd.f32 %v731_v25, %v645_v61  ;;  %v867_v28 = vadd.f32 %v866_v43, %v804_v22 }
 0x145   :  { %v868_v29 = vadd.f32 %v867_v28, %v805_v53  ;;  %v733_v10 = vadd.f32 %v732_v55, %v648_v14 }
 0x147   :  { %v734_v32 = vadd.f32 %v1064_v52, %v733_v10  ;;  %v869_v26 = vadd.f32 %v868_v29, %v806_v8 }
 0x149   :  { %v870_v36 = vadd.f32 %v869_v26, %v807_v30  ;;  %v735_v63 = vadd.f32 %v1065_v5, %v734_v32 }
 0x14b   :  { %v736_v24 = vadd.f32 %v735_v63, %v661_v27  ;;  %v871_v17 = vadd.f32 %v870_v36, %v808_v34 }
 0x14d   :  { %v872_v40 = vadd.f32 %v871_v17, %v809_v39  ;;  %v737_v37 = vadd.f32 %v736_v24, %v664_v38 }
 0x14f   :  { %v738_v42 = vadd.f32 %v1068_v58, %v737_v37  ;;  %v873_v46 = vadd.f32 %v872_v40, %v810_v41 }
 0x151   :  { %v739_v3 = vadd.f32 %v1069_v31, %v738_v42  ;;  %v874_v49 = vadd.f32 %v873_v46, %v811_v45 }
 0x153   :  { %v740_v50 = vrot.slane %v739_v3, 4  ;;  %v875_v51 = vadd.f32 %v874_v49, %v812_v47 }
 0x155   :  { %v741_v52 = vadd.f32 %v740_v50, %v739_v3  ;;  %v876_v35 = vrot.slane %v875_v51, 4 }
 0x157   :  { %v742_v54 = vrot.slane %v741_v52, 2  ;;  %v877_v57 = vadd.f32 %v876_v35, %v875_v51 }
 0x159   :  { %v743_v56 = vadd.f32 %v742_v54, %v741_v52  ;;  %v878_v59 = vrot.slane %v877_v57, 2 }
 0x15b   :  { %v744_v60 = vrot.slane %v743_v56, 1  ;;  %v879_v61 = vadd.f32 %v878_v59, %v877_v57 }
 0x15d   :  { %v745_v62 = vadd.f32 %v744_v60, %v743_v56  ;;  %v880_v23 = vrot.slane %v879_v61, 1 }
 0x15f   :  { %v881_v0 = vadd.f32 %v880_v23, %v879_v61  ;;  %747 = vst [vmem:[%s1357_s2] sm:$0xff] %v745_v62 }
 0x161   :  { %883 = vst [vmem:[%s1358_s3] sm:$0xff] %v881_v0 }

// kernel: cnn_block_forward.3
= control target key start
LH: loop header
LB: loop body
LE: loop exit
PB: predicated region body
PF: predicated region fallthrough
CT: control target
= control target key end

     0   :  { %vm266_vm0 = vcmask 392192   ;;  %s1697_s1 = inlined_call_operand.vmem [shape: bf16[48,128], index: 1, kind: input, shape index: {}]   ;;  %s1698_s0 = inlined_call_operand.vmem [shape: bf16[512,48], index: 0, kind: input, shape index: {}]   ;;  %s1699_s2 = inlined_call_operand.vmem [shape: f32[1,128], index: 2, kind: input, shape index: {}]   ;;  %s1700_s3 = inlined_call_operand.vmem [shape: f32[1,128], index: 3, kind: input, shape index: {}]   ;;  %s1701_s4 = inlined_call_operand.vmem [shape: f32[512,128], index: 4, kind: output, shape index: {}]  }
   0x1   :  { %v1170_v0 = vld [vmem:[%s1697_s1 + $0x10] sm:$0xff]   ;;  %v1171_v1 = vld [vmem:[%s1697_s1 + $0x8] sm:$0xff]   ;;  %v1172_v2 = vld [vmem:[%s1697_s1] sm:$0xff]  }
   0x2   :  { %1094 = vmatprep.subr.bf16.mxu0 %v1170_v0  ;;  %1164 = vmatprep.subr.bf16.mxu1 %v1170_v0  ;;  %v1173_v3 = vld [vmem:[%s1698_s0] sm:$0xff]   ;;  %v1175_v5 = vld [vmem:[%s1698_s0 + $0x8] sm:$0xff]   ;;  %v1177_v7 = vld [vmem:[%s1698_s0 + $0x10] sm:$0xff]  }
   0x3   :  { %1095 = vmatpush3.bf16.msra.mxu0 %v1170_v0  ;;  %1167 = vmatpush3.bf16.msra.mxu1 %v1170_v0  ;;  %v1174_v4 = vld [vmem:[%s1698_s0 + $0x80] sm:$0xff]   ;;  %v1176_v6 = vld [vmem:[%s1698_s0 + $0x88] sm:$0xff]   ;;  %v1178_v8 = vld [vmem:[%s1698_s0 + $0x90] sm:$0xff]  }
   0x4   :  { %1096 = vmatprep.subr.bf16.mxu0 %v1171_v1  ;;  %1165 = vmatprep.subr.bf16.mxu1 %v1171_v1  ;;  %v1179_v9 = vld [vmem:[%s1698_s0 + $0x18] sm:$0xff]   ;;  %v1181_v11 = vld [vmem:[%s1698_s0 + $0x20] sm:$0xff]   ;;  %v1183_v13 = vld [vmem:[%s1698_s0 + $0x28] sm:$0xff]  }
   0x5   :  { %1100 = vmatprep.mubr.msk.bf16.mxu0 %vm266_vm0, %v1173_v3  ;;  %1132 = vmatprep.mubr.msk.bf16.mxu1 %vm266_vm0, %v1174_v4  ;;  %v1180_v10 = vld [vmem:[%s1698_s0 + $0x98] sm:$0xff]   ;;  %v1182_v12 = vld [vmem:[%s1698_s0 + $0xa0] sm:$0xff]   ;;  %v1184_v14 = vld [vmem:[%s1698_s0 + $0xa8] sm:$0xff]  }
   0x6   :  { %v1185_v15 = vld [vmem:[%s1698_s0 + $0x30] sm:$0xff]   ;;  %v1187_v17 = vld [vmem:[%s1698_s0 + $0x38] sm:$0xff]   ;;  %v1189_v19 = vld [vmem:[%s1698_s0 + $0x40] sm:$0xff]  }
   0x7   :  { %1097 = vmatpush3.bf16.msra.mxu0 %v1171_v1  ;;  %1168 = vmatpush3.bf16.msra.mxu1 %v1171_v1  ;;  %v1186_v16 = vld [vmem:[%s1698_s0 + $0xb0] sm:$0xff]   ;;  %v1188_v18 = vld [vmem:[%s1698_s0 + $0xb8] sm:$0xff]   ;;  %v1190_v20 = vld [vmem:[%s1698_s0 + $0xc0] sm:$0xff]  }
   0x8   :  { %1098 = vmatprep.subr.bf16.mxu0 %v1172_v2  ;;  %1166 = vmatprep.subr.bf16.mxu1 %v1172_v2  ;;  %v1191_v21 = vld [vmem:[%s1698_s0 + $0x48] sm:$0xff]   ;;  %v1193_v23 = vld [vmem:[%s1698_s0 + $0x50] sm:$0xff]   ;;  %v1195_v25 = vld [vmem:[%s1698_s0 + $0x58] sm:$0xff]  }
   0x9   :  { %v1192_v22 = vld [vmem:[%s1698_s0 + $0xc8] sm:$0xff]   ;;  %v1194_v24 = vld [vmem:[%s1698_s0 + $0xd0] sm:$0xff]   ;;  %v1196_v26 = vld [vmem:[%s1698_s0 + $0xd8] sm:$0xff]  }
   0xa   :  { %v1197_v27 = vld [vmem:[%s1698_s0 + $0x60] sm:$0xff]   ;;  %v1199_v29 = vld [vmem:[%s1698_s0 + $0x68] sm:$0xff]   ;;  %v1201_v31 = vld [vmem:[%s1698_s0 + $0x70] sm:$0xff]  }
   0xb   :  { %1099 = vmatpush3.bf16.msra.mxu0 %v1172_v2  ;;  %1169 = vmatpush3.bf16.msra.mxu1 %v1172_v2  ;;  %v1198_v28 = vld [vmem:[%s1698_s0 + $0xe0] sm:$0xff]   ;;  %v1200_v30 = vld [vmem:[%s1698_s0 + $0xe8] sm:$0xff]   ;;  %v1202_v32 = vld [vmem:[%s1698_s0 + $0xf0] sm:$0xff]  }
   0xc   :  { %v1203_v33 = vld [vmem:[%s1698_s0 + $0x78] sm:$0xff]   ;;  %v1370_v35 = vld [vmem:[%s1699_s2] ss:$0 sm:$0xff] }
   0xd   :  { %v1204_v34 = vld [vmem:[%s1698_s0 + $0xf8] sm:$0xff]   ;;  %v1375_v37 = vld [vmem:[%s1700_s3] ss:$0 sm:$0xff] }
   0xe   :  { %1101 = vmatmul.mubr.msk.bf16.vlgmr.msra.gmra.mxu0 %vm266_vm0, %v1175_v5  ;;  %1133 = vmatmul.mubr.msk.bf16.vlgmr.msra.gmra.mxu1 %vm266_vm0, %v1176_v6 }
   0xf   :  { %1104 = vmatprep.mubr.msk.bf16.mxu0 %vm266_vm0, %v1177_v7  ;;  %1136 = vmatprep.mubr.msk.bf16.mxu1 %vm266_vm0, %v1178_v8 }
  0x16   :  { %1105 = vmatmul.mubr.msk.bf16.gmra.mxu0 %vm266_vm0, %v1179_v9  ;;  %1137 = vmatmul.mubr.msk.bf16.gmra.mxu1 %vm266_vm0, %v1180_v10 }
  0x17   :  { %1108 = vmatprep.mubr.msk.bf16.mxu0 %vm266_vm0, %v1181_v11  ;;  %1140 = vmatprep.mubr.msk.bf16.mxu1 %vm266_vm0, %v1182_v12 }
  0x1e   :  { %1109 = vmatmul.mubr.msk.bf16.gmra.mxu0 %vm266_vm0, %v1183_v13  ;;  %1141 = vmatmul.mubr.msk.bf16.gmra.mxu1 %vm266_vm0, %v1184_v14 }
  0x1f   :  { %1112 = vmatprep.mubr.msk.bf16.mxu0 %vm266_vm0, %v1185_v15  ;;  %1144 = vmatprep.mubr.msk.bf16.mxu1 %vm266_vm0, %v1186_v16 }
  0x26   :  { %1113 = vmatmul.mubr.msk.bf16.gmra.mxu0 %vm266_vm0, %v1187_v17  ;;  %1145 = vmatmul.mubr.msk.bf16.gmra.mxu1 %vm266_vm0, %v1188_v18 }
  0x27   :  { %1116 = vmatprep.mubr.msk.bf16.mxu0 %vm266_vm0, %v1189_v19  ;;  %1148 = vmatprep.mubr.msk.bf16.mxu1 %vm266_vm0, %v1190_v20 }
  0x2e   :  { %1117 = vmatmul.mubr.msk.bf16.gmra.mxu0 %vm266_vm0, %v1191_v21  ;;  %1149 = vmatmul.mubr.msk.bf16.gmra.mxu1 %vm266_vm0, %v1192_v22 }
  0x2f   :  { %1120 = vmatprep.mubr.msk.bf16.mxu0 %vm266_vm0, %v1193_v23  ;;  %1152 = vmatprep.mubr.msk.bf16.mxu1 %vm266_vm0, %v1194_v24 }
  0x36   :  { %1121 = vmatmul.mubr.msk.bf16.gmra.mxu0 %vm266_vm0, %v1195_v25  ;;  %1153 = vmatmul.mubr.msk.bf16.gmra.mxu1 %vm266_vm0, %v1196_v26 }
  0x37   :  { %1124 = vmatprep.mubr.msk.bf16.mxu0 %vm266_vm0, %v1197_v27  ;;  %1156 = vmatprep.mubr.msk.bf16.mxu1 %vm266_vm0, %v1198_v28 }
  0x3e   :  { %1125 = vmatmul.mubr.msk.bf16.gmra.mxu0 %vm266_vm0, %v1199_v29  ;;  %1157 = vmatmul.mubr.msk.bf16.gmra.mxu1 %vm266_vm0, %v1200_v30 }
  0x3f   :  { %1128 = vmatprep.mubr.msk.bf16.mxu0 %vm266_vm0, %v1201_v31  ;;  %1160 = vmatprep.mubr.msk.bf16.mxu1 %vm266_vm0, %v1202_v32 }
  0x46   :  { %1129 = vmatmul.mubr.msk.bf16.gmra.mxu0 %vm266_vm0, %v1203_v33  ;;  %1161 = vmatmul.mubr.msk.bf16.gmra.mxu1 %vm266_vm0, %v1204_v34 }
  0xce   :  { %v1102_v36 = vpop.f32.mrf.mxu0  ;;  %v1134_v38 = vpop.f32.mrf.mxu1 }
  0xcf   :  { %v661_v39 = vmul.f32 %v1102_v36, %v1370_v35  ;;  %v693_v40 = vmul.f32 %v1134_v38, %v1370_v35 }
  0xd0   :  { %v397_v41 = vpop.f32.mrf.mxu0  ;;  %v525_v42 = vpop.f32.mrf.mxu1 }
  0xd1   :  { %v732_v43 = vadd.f32 %v1375_v37, %v661_v39  ;;  %v764_v44 = vadd.f32 %v1375_v37, %v693_v40  ;;  %v659_v45 = vmul.f32 %v1370_v35, %v397_v41  ;;  %v691_v46 = vmul.f32 %v1370_v35, %v525_v42 }
  0xd2   :  { %v1103_v47 = vpop.f32.mrf.mxu0  ;;  %v1135_v48 = vpop.f32.mrf.mxu1 }
  0xd3   :  { %v796_v49 = vmul.f32 0.1, %v732_v43  ;;  %v828_v50 = vmul.f32 0.1, %v764_v44  ;;  %v730_v51 = vadd.f32 %v1375_v37, %v659_v45  ;;  %v762_v52 = vadd.f32 %v1375_v37, %v691_v46 }
  0xd4   :  { %v662_v53 = vmul.f32 %v1103_v47, %v1370_v35  ;;  %v694_v54 = vmul.f32 %v1135_v48, %v1370_v35  ;;  %v400_v55 = vpop.f32.mrf.mxu0  ;;  %v528_v56 = vpop.f32.mrf.mxu1 }
  0xd5   :  { %v860_v57 = vmax.f32 %v732_v43, %v796_v49  ;;  %v892_v58 = vmax.f32 %v764_v44, %v828_v50  ;;  %v794_v59 = vmul.f32 0.1, %v730_v51  ;;  %v826_v60 = vmul.f32 0.1, %v762_v52 }
  0xd6   :  { %v733_v61 = vadd.f32 %v1375_v37, %v662_v53  ;;  %v765_v62 = vadd.f32 %v1375_v37, %v694_v54  ;;  %v660_v63 = vmul.f32 %v1370_v35, %v400_v55  ;;  %v692_v0 = vmul.f32 %v1370_v35, %v528_v56  ;;  %v1106_v1 = vpop.f32.mrf.mxu0  ;;  %v1138_v2 = vpop.f32.mrf.mxu1 }
  0xd7   :  { %924 = vst [vmem:[%s1701_s4 + $0x10] sm:$0xff] %v860_v57  ;;  %956 = vst [vmem:[%s1701_s4 + $0x110] sm:$0xff] %v892_v58  ;;  %v858_v3 = vmax.f32 %v730_v51, %v794_v59  ;;  %v890_v4 = vmax.f32 %v762_v52, %v826_v60  ;;  %v665_v5 = vmul.f32 %v1106_v1, %v1370_v35 }
  0xd8   :  { %v697_v6 = vmul.f32 %v1138_v2, %v1370_v35  ;;  %v797_v7 = vmul.f32 0.1, %v733_v61  ;;  %v829_v8 = vmul.f32 0.1, %v765_v62  ;;  %v731_v9 = vadd.f32 %v1375_v37, %v660_v63  ;;  %v413_v11 = vpop.f32.mrf.mxu0  ;;  %v541_v12 = vpop.f32.mrf.mxu1 }
  0xd9   :  { %v763_v10 = vadd.f32 %v1375_v37, %v692_v0  ;;  %922 = vst [vmem:[%s1701_s4] sm:$0xff] %v858_v3  ;;  %954 = vst [vmem:[%s1701_s4 + $0x100] sm:$0xff] %v890_v4  ;;  %v736_v13 = vadd.f32 %v1375_v37, %v665_v5  ;;  %v663_v15 = vmul.f32 %v1370_v35, %v413_v11 }
  0xda   :  { %v768_v14 = vadd.f32 %v1375_v37, %v697_v6  ;;  %v695_v16 = vmul.f32 %v1370_v35, %v541_v12  ;;  %v861_v17 = vmax.f32 %v733_v61, %v797_v7  ;;  %v893_v18 = vmax.f32 %v765_v62, %v829_v8  ;;  %v1107_v21 = vpop.f32.mrf.mxu0  ;;  %v1139_v22 = vpop.f32.mrf.mxu1 }
  0xdb   :  { %v795_v19 = vmul.f32 0.1, %v731_v9  ;;  %v827_v20 = vmul.f32 0.1, %v763_v10  ;;  %v800_v23 = vmul.f32 0.1, %v736_v13  ;;  %v734_v25 = vadd.f32 %v1375_v37, %v663_v15 }
  0xdc   :  { %v832_v24 = vmul.f32 0.1, %v768_v14  ;;  %v766_v26 = vadd.f32 %v1375_v37, %v695_v16  ;;  %925 = vst [vmem:[%s1701_s4 + $0x18] sm:$0xff] %v861_v17  ;;  %957 = vst [vmem:[%s1701_s4 + $0x118] sm:$0xff] %v893_v18  ;;  %v666_v29 = vmul.f32 %v1107_v21, %v1370_v35  ;;  %v698_v30 = vmul.f32 %v1139_v22, %v1370_v35  ;;  %v416_v31 = vpop.f32.mrf.mxu0  ;;  %v544_v32 = vpop.f32.mrf.mxu1 }
  0xdd   :  { %v859_v27 = vmax.f32 %v731_v9, %v795_v19  ;;  %v891_v28 = vmax.f32 %v763_v10, %v827_v20  ;;  %v864_v33 = vmax.f32 %v736_v13, %v800_v23  ;;  %v798_v36 = vmul.f32 0.1, %v734_v25 }
  0xde   :  { %v896_v34 = vmax.f32 %v768_v14, %v832_v24  ;;  %v830_v38 = vmul.f32 0.1, %v766_v26  ;;  %v737_v39 = vadd.f32 %v1375_v37, %v666_v29  ;;  %v769_v40 = vadd.f32 %v1375_v37, %v698_v30  ;;  %v1110_v43 = vpop.f32.mrf.mxu0  ;;  %v1142_v44 = vpop.f32.mrf.mxu1 }
  0xdf   :  { %923 = vst [vmem:[%s1701_s4 + $0x8] sm:$0xff] %v859_v27  ;;  %955 = vst [vmem:[%s1701_s4 + $0x108] sm:$0xff] %v891_v28  ;;  %v664_v41 = vmul.f32 %v1370_v35, %v416_v31  ;;  %v696_v42 = vmul.f32 %v1370_v35, %v544_v32  ;;  %v862_v45 = vmax.f32 %v734_v25, %v798_v36 }
  0xe0   :  { %928 = vst [vmem:[%s1701_s4 + $0x30] sm:$0xff] %v864_v33  ;;  %960 = vst [vmem:[%s1701_s4 + $0x130] sm:$0xff] %v896_v34  ;;  %v894_v46 = vmax.f32 %v766_v26, %v830_v38  ;;  %v669_v47 = vmul.f32 %v1110_v43, %v1370_v35  ;;  %v701_v48 = vmul.f32 %v1142_v44, %v1370_v35  ;;  %v801_v49 = vmul.f32 0.1, %v737_v39  ;;  %v429_v53 = vpop.f32.mrf.mxu0  ;;  %v557_v54 = vpop.f32.mrf.mxu1 }
  0xe1   :  { %v833_v50 = vmul.f32 0.1, %v769_v40  ;;  %v735_v51 = vadd.f32 %v1375_v37, %v664_v41  ;;  %v767_v52 = vadd.f32 %v1375_v37, %v696_v42  ;;  %926 = vst [vmem:[%s1701_s4 + $0x20] sm:$0xff] %v862_v45  ;;  %v667_v57 = vmul.f32 %v1370_v35, %v429_v53 }
  0xe2   :  { %958 = vst [vmem:[%s1701_s4 + $0x120] sm:$0xff] %v894_v46  ;;  %v740_v55 = vadd.f32 %v1375_v37, %v669_v47  ;;  %v772_v56 = vadd.f32 %v1375_v37, %v701_v48  ;;  %v699_v58 = vmul.f32 %v1370_v35, %v557_v54  ;;  %v865_v59 = vmax.f32 %v737_v39, %v801_v49  ;;  %v1111_v63 = vpop.f32.mrf.mxu0  ;;  %v1143_v0 = vpop.f32.mrf.mxu1 }
  0xe3   :  { %v897_v60 = vmax.f32 %v769_v40, %v833_v50  ;;  %v799_v61 = vmul.f32 0.1, %v735_v51  ;;  %v831_v62 = vmul.f32 0.1, %v767_v52  ;;  %v738_v3 = vadd.f32 %v1375_v37, %v667_v57 }
  0xe4   :  { %v804_v1 = vmul.f32 0.1, %v740_v55  ;;  %v836_v2 = vmul.f32 0.1, %v772_v56  ;;  %v770_v4 = vadd.f32 %v1375_v37, %v699_v58  ;;  %929 = vst [vmem:[%s1701_s4 + $0x38] sm:$0xff] %v865_v59  ;;  %v670_v7 = vmul.f32 %v1111_v63, %v1370_v35  ;;  %v432_v9 = vpop.f32.mrf.mxu0  ;;  %v560_v10 = vpop.f32.mrf.mxu1 }
  0xe5   :  { %961 = vst [vmem:[%s1701_s4 + $0x138] sm:$0xff] %v897_v60  ;;  %v863_v5 = vmax.f32 %v735_v51, %v799_v61  ;;  %v895_v6 = vmax.f32 %v767_v52, %v831_v62  ;;  %v702_v8 = vmul.f32 %v1143_v0, %v1370_v35  ;;  %v802_v13 = vmul.f32 0.1, %v738_v3 }
  0xe6   :  { %v868_v11 = vmax.f32 %v740_v55, %v804_v1  ;;  %v900_v12 = vmax.f32 %v772_v56, %v836_v2  ;;  %v834_v14 = vmul.f32 0.1, %v770_v4  ;;  %v741_v15 = vadd.f32 %v1375_v37, %v670_v7  ;;  %v1114_v19 = vpop.f32.mrf.mxu0  ;;  %v1146_v20 = vpop.f32.mrf.mxu1 }
  0xe7   :  { %927 = vst [vmem:[%s1701_s4 + $0x28] sm:$0xff] %v863_v5  ;;  %959 = vst [vmem:[%s1701_s4 + $0x128] sm:$0xff] %v895_v6  ;;  %v773_v16 = vadd.f32 %v1375_v37, %v702_v8  ;;  %v668_v17 = vmul.f32 %v1370_v35, %v432_v9  ;;  %v700_v18 = vmul.f32 %v1370_v35, %v560_v10 }
  0xe8   :  { %932 = vst [vmem:[%s1701_s4 + $0x50] sm:$0xff] %v868_v11  ;;  %964 = vst [vmem:[%s1701_s4 + $0x150] sm:$0xff] %v900_v12  ;;  %v866_v21 = vmax.f32 %v738_v3, %v802_v13  ;;  %v898_v22 = vmax.f32 %v770_v4, %v834_v14  ;;  %v673_v23 = vmul.f32 %v1114_v19, %v1370_v35  ;;  %v805_v25 = vmul.f32 0.1, %v741_v15  ;;  %v445_v29 = vpop.f32.mrf.mxu0  ;;  %v573_v30 = vpop.f32.mrf.mxu1 }
  0xe9   :  { %v705_v24 = vmul.f32 %v1146_v20, %v1370_v35  ;;  %v837_v26 = vmul.f32 0.1, %v773_v16  ;;  %v739_v27 = vadd.f32 %v1375_v37, %v668_v17  ;;  %v771_v28 = vadd.f32 %v1375_v37, %v700_v18 }
  0xea   :  { %930 = vst [vmem:[%s1701_s4 + $0x40] sm:$0xff] %v866_v21  ;;  %962 = vst [vmem:[%s1701_s4 + $0x140] sm:$0xff] %v898_v22  ;;  %v744_v31 = vadd.f32 %v1375_v37, %v673_v23  ;;  %v671_v33 = vmul.f32 %v1370_v35, %v445_v29  ;;  %v703_v34 = vmul.f32 %v1370_v35, %v573_v30  ;;  %v1115_v41 = vpop.f32.mrf.mxu0  ;;  %v1147_v42 = vpop.f32.mrf.mxu1 }
  0xeb   :  { %v776_v32 = vadd.f32 %v1375_v37, %v705_v24  ;;  %v869_v36 = vmax.f32 %v741_v15, %v805_v25  ;;  %v901_v38 = vmax.f32 %v773_v16, %v837_v26  ;;  %v803_v39 = vmul.f32 0.1, %v739_v27 }
  0xec   :  { %v835_v40 = vmul.f32 0.1, %v771_v28  ;;  %v808_v43 = vmul.f32 0.1, %v744_v31  ;;  %v742_v45 = vadd.f32 %v1375_v37, %v671_v33  ;;  %v774_v46 = vadd.f32 %v1375_v37, %v703_v34  ;;  %v448_v51 = vpop.f32.mrf.mxu0  ;;  %v576_v52 = vpop.f32.mrf.mxu1 }
  0xed   :  { %v840_v44 = vmul.f32 0.1, %v776_v32  ;;  %933 = vst [vmem:[%s1701_s4 + $0x58] sm:$0xff] %v869_v36  ;;  %965 = vst [vmem:[%s1701_s4 + $0x158] sm:$0xff] %v901_v38  ;;  %v867_v47 = vmax.f32 %v739_v27, %v803_v39  ;;  %v674_v49 = vmul.f32 %v1115_v41, %v1370_v35  ;;  %v706_v50 = vmul.f32 %v1147_v42, %v1370_v35 }
  0xee   :  { %v899_v48 = vmax.f32 %v771_v28, %v835_v40  ;;  %v872_v53 = vmax.f32 %v744_v31, %v808_v43  ;;  %v806_v55 = vmul.f32 0.1, %v742_v45  ;;  %v838_v56 = vmul.f32 0.1, %v774_v46  ;;  %v1118_v61 = vpop.f32.mrf.mxu0  ;;  %v1150_v62 = vpop.f32.mrf.mxu1 }
  0xef   :  { %v904_v54 = vmax.f32 %v776_v32, %v840_v44  ;;  %931 = vst [vmem:[%s1701_s4 + $0x48] sm:$0xff] %v867_v47  ;;  %v745_v57 = vadd.f32 %v1375_v37, %v674_v49  ;;  %v777_v58 = vadd.f32 %v1375_v37, %v706_v50  ;;  %v672_v59 = vmul.f32 %v1370_v35, %v448_v51 }
  0xf0   :  { %963 = vst [vmem:[%s1701_s4 + $0x148] sm:$0xff] %v899_v48  ;;  %v704_v60 = vmul.f32 %v1370_v35, %v576_v52  ;;  %936 = vst [vmem:[%s1701_s4 + $0x70] sm:$0xff] %v872_v53  ;;  %v870_v63 = vmax.f32 %v742_v45, %v806_v55  ;;  %v902_v0 = vmax.f32 %v774_v46, %v838_v56  ;;  %v461_v7 = vpop.f32.mrf.mxu0  ;;  %v589_v8 = vpop.f32.mrf.mxu1 }
  0xf1   :  { %968 = vst [vmem:[%s1701_s4 + $0x170] sm:$0xff] %v904_v54  ;;  %v677_v1 = vmul.f32 %v1118_v61, %v1370_v35  ;;  %v709_v2 = vmul.f32 %v1150_v62, %v1370_v35  ;;  %v809_v3 = vmul.f32 0.1, %v745_v57  ;;  %v841_v4 = vmul.f32 0.1, %v777_v58 }
  0xf2   :  { %v743_v5 = vadd.f32 %v1375_v37, %v672_v59  ;;  %v775_v6 = vadd.f32 %v1375_v37, %v704_v60  ;;  %934 = vst [vmem:[%s1701_s4 + $0x60] sm:$0xff] %v870_v63  ;;  %966 = vst [vmem:[%s1701_s4 + $0x160] sm:$0xff] %v902_v0  ;;  %v675_v11 = vmul.f32 %v1370_v35, %v461_v7  ;;  %v1119_v17 = vpop.f32.mrf.mxu0  ;;  %v1151_v18 = vpop.f32.mrf.mxu1 }
  0xf3   :  { %v748_v9 = vadd.f32 %v1375_v37, %v677_v1  ;;  %v780_v10 = vadd.f32 %v1375_v37, %v709_v2  ;;  %v707_v12 = vmul.f32 %v1370_v35, %v589_v8  ;;  %v873_v13 = vmax.f32 %v745_v57, %v809_v3 }
  0xf4   :  { %v905_v14 = vmax.f32 %v777_v58, %v841_v4  ;;  %v807_v15 = vmul.f32 0.1, %v743_v5  ;;  %v839_v16 = vmul.f32 0.1, %v775_v6  ;;  %v746_v21 = vadd.f32 %v1375_v37, %v675_v11  ;;  %v464_v27 = vpop.f32.mrf.mxu0  ;;  %v592_v28 = vpop.f32.mrf.mxu1 }
  0xf5   :  { %v812_v19 = vmul.f32 0.1, %v748_v9  ;;  %v844_v20 = vmul.f32 0.1, %v780_v10  ;;  %v778_v22 = vadd.f32 %v1375_v37, %v707_v12  ;;  %937 = vst [vmem:[%s1701_s4 + $0x78] sm:$0xff] %v873_v13  ;;  %v678_v25 = vmul.f32 %v1119_v17, %v1370_v35 }
  0xf6   :  { %969 = vst [vmem:[%s1701_s4 + $0x178] sm:$0xff] %v905_v14  ;;  %v871_v23 = vmax.f32 %v743_v5, %v807_v15  ;;  %v903_v24 = vmax.f32 %v775_v6, %v839_v16  ;;  %v710_v26 = vmul.f32 %v1151_v18, %v1370_v35  ;;  %v810_v31 = vmul.f32 0.1, %v746_v21  ;;  %v1122_v39 = vpop.f32.mrf.mxu0  ;;  %v1154_v40 = vpop.f32.mrf.mxu1 }
  0xf7   :  { %v876_v29 = vmax.f32 %v748_v9, %v812_v19  ;;  %v908_v30 = vmax.f32 %v780_v10, %v844_v20  ;;  %v842_v32 = vmul.f32 0.1, %v778_v22  ;;  %v749_v33 = vadd.f32 %v1375_v37, %v678_v25 }
  0xf8   :  { %935 = vst [vmem:[%s1701_s4 + $0x68] sm:$0xff] %v871_v23  ;;  %967 = vst [vmem:[%s1701_s4 + $0x168] sm:$0xff] %v903_v24  ;;  %v781_v34 = vadd.f32 %v1375_v37, %v710_v26  ;;  %v676_v36 = vmul.f32 %v1370_v35, %v464_v27  ;;  %v708_v38 = vmul.f32 %v1370_v35, %v592_v28  ;;  %v477_v49 = vpop.f32.mrf.mxu0  ;;  %v605_v50 = vpop.f32.mrf.mxu1 }
  0xf9   :  { %940 = vst [vmem:[%s1701_s4 + $0x90] sm:$0xff] %v876_v29  ;;  %972 = vst [vmem:[%s1701_s4 + $0x190] sm:$0xff] %v908_v30  ;;  %v874_v41 = vmax.f32 %v746_v21, %v810_v31  ;;  %v906_v42 = vmax.f32 %v778_v22, %v842_v32  ;;  %v681_v43 = vmul.f32 %v1122_v39, %v1370_v35  ;;  %v813_v45 = vmul.f32 0.1, %v749_v33 }
  0xfa   :  { %v713_v44 = vmul.f32 %v1154_v40, %v1370_v35  ;;  %v845_v46 = vmul.f32 0.1, %v781_v34  ;;  %v747_v47 = vadd.f32 %v1375_v37, %v676_v36  ;;  %v779_v48 = vadd.f32 %v1375_v37, %v708_v38  ;;  %v1123_v59 = vpop.f32.mrf.mxu0  ;;  %v1155_v60 = vpop.f32.mrf.mxu1 }
  0xfb   :  { %938 = vst [vmem:[%s1701_s4 + $0x80] sm:$0xff] %v874_v41  ;;  %970 = vst [vmem:[%s1701_s4 + $0x180] sm:$0xff] %v906_v42  ;;  %v752_v51 = vadd.f32 %v1375_v37, %v681_v43  ;;  %v679_v53 = vmul.f32 %v1370_v35, %v477_v49  ;;  %v711_v54 = vmul.f32 %v1370_v35, %v605_v50 }
  0xfc   :  { %v784_v52 = vadd.f32 %v1375_v37, %v713_v44  ;;  %v877_v55 = vmax.f32 %v749_v33, %v813_v45  ;;  %v909_v56 = vmax.f32 %v781_v34, %v845_v46  ;;  %v811_v57 = vmul.f32 0.1, %v747_v47  ;;  %v480_v5 = vpop.f32.mrf.mxu0  ;;  %v608_v6 = vpop.f32.mrf.mxu1 }
  0xfd   :  { %v843_v58 = vmul.f32 0.1, %v779_v48  ;;  %v816_v61 = vmul.f32 0.1, %v752_v51  ;;  %v750_v63 = vadd.f32 %v1375_v37, %v679_v53  ;;  %v782_v0 = vadd.f32 %v1375_v37, %v711_v54 }
  0xfe   :  { %v848_v62 = vmul.f32 0.1, %v784_v52  ;;  %941 = vst [vmem:[%s1701_s4 + $0x98] sm:$0xff] %v877_v55  ;;  %973 = vst [vmem:[%s1701_s4 + $0x198] sm:$0xff] %v909_v56  ;;  %v875_v1 = vmax.f32 %v747_v47, %v811_v57  ;;  %v682_v3 = vmul.f32 %v1123_v59, %v1370_v35  ;;  %v714_v4 = vmul.f32 %v1155_v60, %v1370_v35  ;;  %v1126_v15 = vpop.f32.mrf.mxu0  ;;  %v1158_v16 = vpop.f32.mrf.mxu1 }
  0xff   :  { %v907_v2 = vmax.f32 %v779_v48, %v843_v58  ;;  %v880_v7 = vmax.f32 %v752_v51, %v816_v61  ;;  %v814_v9 = vmul.f32 0.1, %v750_v63  ;;  %v846_v10 = vmul.f32 0.1, %v782_v0 }
 0x100   :  { %v912_v8 = vmax.f32 %v784_v52, %v848_v62  ;;  %939 = vst [vmem:[%s1701_s4 + $0x88] sm:$0xff] %v875_v1  ;;  %v753_v11 = vadd.f32 %v1375_v37, %v682_v3  ;;  %v785_v12 = vadd.f32 %v1375_v37, %v714_v4  ;;  %v680_v13 = vmul.f32 %v1370_v35, %v480_v5  ;;  %v493_v25 = vpop.f32.mrf.mxu0  ;;  %v621_v26 = vpop.f32.mrf.mxu1 }
 0x101   :  { %971 = vst [vmem:[%s1701_s4 + $0x188] sm:$0xff] %v907_v2  ;;  %v712_v14 = vmul.f32 %v1370_v35, %v608_v6  ;;  %944 = vst [vmem:[%s1701_s4 + $0xb0] sm:$0xff] %v880_v7  ;;  %v878_v17 = vmax.f32 %v750_v63, %v814_v9  ;;  %v910_v18 = vmax.f32 %v782_v0, %v846_v10 }
 0x102   :  { %976 = vst [vmem:[%s1701_s4 + $0x1b0] sm:$0xff] %v912_v8  ;;  %v685_v19 = vmul.f32 %v1126_v15, %v1370_v35  ;;  %v717_v20 = vmul.f32 %v1158_v16, %v1370_v35  ;;  %v817_v21 = vmul.f32 0.1, %v753_v11  ;;  %v849_v22 = vmul.f32 0.1, %v785_v12  ;;  %v1127_v36 = vpop.f32.mrf.mxu0  ;;  %v1159_v38 = vpop.f32.mrf.mxu1 }
 0x103   :  { %v751_v23 = vadd.f32 %v1375_v37, %v680_v13  ;;  %v783_v24 = vadd.f32 %v1375_v37, %v712_v14  ;;  %942 = vst [vmem:[%s1701_s4 + $0xa0] sm:$0xff] %v878_v17  ;;  %974 = vst [vmem:[%s1701_s4 + $0x1a0] sm:$0xff] %v910_v18  ;;  %v683_v29 = vmul.f32 %v1370_v35, %v493_v25 }
 0x104   :  { %v756_v27 = vadd.f32 %v1375_v37, %v685_v19  ;;  %v788_v28 = vadd.f32 %v1375_v37, %v717_v20  ;;  %v715_v30 = vmul.f32 %v1370_v35, %v621_v26  ;;  %v881_v31 = vmax.f32 %v753_v11, %v817_v21  ;;  %v496_v47 = vpop.f32.mrf.mxu0  ;;  %v624_v48 = vpop.f32.mrf.mxu1 }
 0x105   :  { %v913_v32 = vmax.f32 %v785_v12, %v849_v22  ;;  %v815_v33 = vmul.f32 0.1, %v751_v23  ;;  %v847_v34 = vmul.f32 0.1, %v783_v24  ;;  %v754_v41 = vadd.f32 %v1375_v37, %v683_v29 }
 0x106   :  { %v820_v39 = vmul.f32 0.1, %v756_v27  ;;  %v852_v40 = vmul.f32 0.1, %v788_v28  ;;  %v786_v42 = vadd.f32 %v1375_v37, %v715_v30  ;;  %945 = vst [vmem:[%s1701_s4 + $0xb8] sm:$0xff] %v881_v31  ;;  %v686_v45 = vmul.f32 %v1127_v36, %v1370_v35  ;;  %v1130_v57 = vpop.f32.mrf.mxu0  ;;  %v1162_v58 = vpop.f32.mrf.mxu1 }
 0x107   :  { %977 = vst [vmem:[%s1701_s4 + $0x1b8] sm:$0xff] %v913_v32  ;;  %v879_v43 = vmax.f32 %v751_v23, %v815_v33  ;;  %v911_v44 = vmax.f32 %v783_v24, %v847_v34  ;;  %v718_v46 = vmul.f32 %v1159_v38, %v1370_v35  ;;  %v818_v51 = vmul.f32 0.1, %v754_v41 }
 0x108   :  { %v884_v49 = vmax.f32 %v756_v27, %v820_v39  ;;  %v916_v50 = vmax.f32 %v788_v28, %v852_v40  ;;  %v850_v52 = vmul.f32 0.1, %v786_v42  ;;  %v757_v53 = vadd.f32 %v1375_v37, %v686_v45  ;;  %v509_v3 = vpop.f32.mrf.mxu0  ;;  %v637_v4 = vpop.f32.mrf.mxu1 }
 0x109   :  { %943 = vst [vmem:[%s1701_s4 + $0xa8] sm:$0xff] %v879_v43  ;;  %975 = vst [vmem:[%s1701_s4 + $0x1a8] sm:$0xff] %v911_v44  ;;  %v789_v54 = vadd.f32 %v1375_v37, %v718_v46  ;;  %v684_v55 = vmul.f32 %v1370_v35, %v496_v47  ;;  %v716_v56 = vmul.f32 %v1370_v35, %v624_v48 }
 0x10a   :  { %948 = vst [vmem:[%s1701_s4 + $0xd0] sm:$0xff] %v884_v49  ;;  %980 = vst [vmem:[%s1701_s4 + $0x1d0] sm:$0xff] %v916_v50  ;;  %v882_v59 = vmax.f32 %v754_v41, %v818_v51  ;;  %v914_v60 = vmax.f32 %v786_v42, %v850_v52  ;;  %v689_v61 = vmul.f32 %v1130_v57, %v1370_v35  ;;  %v821_v63 = vmul.f32 0.1, %v757_v53  ;;  %v1131_v13 = vpop.f32.mrf.mxu0  ;;  %v1163_v14 = vpop.f32.mrf.mxu1 }
 0x10b   :  { %v721_v62 = vmul.f32 %v1162_v58, %v1370_v35  ;;  %v853_v0 = vmul.f32 0.1, %v789_v54  ;;  %v755_v1 = vadd.f32 %v1375_v37, %v684_v55  ;;  %v787_v2 = vadd.f32 %v1375_v37, %v716_v56 }
 0x10c   :  { %946 = vst [vmem:[%s1701_s4 + $0xc0] sm:$0xff] %v882_v59  ;;  %978 = vst [vmem:[%s1701_s4 + $0x1c0] sm:$0xff] %v914_v60  ;;  %v760_v5 = vadd.f32 %v1375_v37, %v689_v61  ;;  %v687_v7 = vmul.f32 %v1370_v35, %v509_v3  ;;  %v719_v8 = vmul.f32 %v1370_v35, %v637_v4  ;;  %v512_v23 = vpop.f32.mrf.mxu0  ;;  %v640_v24 = vpop.f32.mrf.mxu1 }
 0x10d   :  { %v792_v6 = vadd.f32 %v1375_v37, %v721_v62  ;;  %v885_v9 = vmax.f32 %v757_v53, %v821_v63  ;;  %v917_v10 = vmax.f32 %v789_v54, %v853_v0  ;;  %v819_v11 = vmul.f32 0.1, %v755_v1 }
 0x10e   :  { %v851_v12 = vmul.f32 0.1, %v787_v2  ;;  %v824_v15 = vmul.f32 0.1, %v760_v5  ;;  %v758_v17 = vadd.f32 %v1375_v37, %v687_v7  ;;  %v790_v18 = vadd.f32 %v1375_v37, %v719_v8 }
 0x10f   :  { %v856_v16 = vmul.f32 0.1, %v792_v6  ;;  %949 = vst [vmem:[%s1701_s4 + $0xd8] sm:$0xff] %v885_v9  ;;  %981 = vst [vmem:[%s1701_s4 + $0x1d8] sm:$0xff] %v917_v10  ;;  %v883_v19 = vmax.f32 %v755_v1, %v819_v11  ;;  %v690_v21 = vmul.f32 %v1131_v13, %v1370_v35  ;;  %v722_v22 = vmul.f32 %v1163_v14, %v1370_v35 }
 0x110   :  { %v915_v20 = vmax.f32 %v787_v2, %v851_v12  ;;  %v888_v25 = vmax.f32 %v760_v5, %v824_v15  ;;  %v822_v27 = vmul.f32 0.1, %v758_v17  ;;  %v854_v28 = vmul.f32 0.1, %v790_v18 }
 0x111   :  { %v920_v26 = vmax.f32 %v792_v6, %v856_v16  ;;  %947 = vst [vmem:[%s1701_s4 + $0xc8] sm:$0xff] %v883_v19  ;;  %v761_v29 = vadd.f32 %v1375_v37, %v690_v21  ;;  %v793_v30 = vadd.f32 %v1375_v37, %v722_v22  ;;  %v688_v31 = vmul.f32 %v1370_v35, %v512_v23 }
 0x112   :  { %979 = vst [vmem:[%s1701_s4 + $0x1c8] sm:$0xff] %v915_v20  ;;  %v720_v32 = vmul.f32 %v1370_v35, %v640_v24  ;;  %952 = vst [vmem:[%s1701_s4 + $0xf0] sm:$0xff] %v888_v25  ;;  %v886_v33 = vmax.f32 %v758_v17, %v822_v27  ;;  %v918_v34 = vmax.f32 %v790_v18, %v854_v28 }
 0x113   :  { %984 = vst [vmem:[%s1701_s4 + $0x1f0] sm:$0xff] %v920_v26  ;;  %v825_v36 = vmul.f32 0.1, %v761_v29  ;;  %v857_v38 = vmul.f32 0.1, %v793_v30  ;;  %v759_v39 = vadd.f32 %v1375_v37, %v688_v31 }
 0x114   :  { %v791_v40 = vadd.f32 %v1375_v37, %v720_v32  ;;  %950 = vst [vmem:[%s1701_s4 + $0xe0] sm:$0xff] %v886_v33  ;;  %982 = vst [vmem:[%s1701_s4 + $0x1e0] sm:$0xff] %v918_v34 }
 0x115   :  { %v889_v35 = vmax.f32 %v761_v29, %v825_v36  ;;  %v921_v41 = vmax.f32 %v793_v30, %v857_v38  ;;  %v823_v42 = vmul.f32 0.1, %v759_v39 }
 0x116   :  { %v855_v43 = vmul.f32 0.1, %v791_v40 }
 0x117   :  { %953 = vst [vmem:[%s1701_s4 + $0xf8] sm:$0xff] %v889_v35  ;;  %985 = vst [vmem:[%s1701_s4 + $0x1f8] sm:$0xff] %v921_v41  ;;  %v887_v37 = vmax.f32 %v759_v39, %v823_v42 }
 0x118   :  { %v919_v44 = vmax.f32 %v791_v40, %v855_v43 }
 0x119   :  { %951 = vst [vmem:[%s1701_s4 + $0xe8] sm:$0xff] %v887_v37 }
 0x11a   :  { %983 = vst [vmem:[%s1701_s4 + $0x1e8] sm:$0xff] %v919_v44 }

</bundles_post_ra>
